<compile_context>
chip_gen: v7x
topology: tpu7x:2x2x1
jax: 0.10.0
libtpu: 0.0.40
codegen_flags: <defaults>
</compile_context>

<pallas_src>
import functools

import jax
import jax.numpy as jnp
from jax import lax
from jax.experimental import pallas as pl
from jax.experimental.pallas import tpu as pltpu


# -----------------------------------------------------------------------------
# Block-size helpers (all static, derived from shapes at trace time).
# -----------------------------------------------------------------------------
def _pick_time_block(T, max_tb=16):
    """Largest divisor of T up to max_tb (timesteps per grid step)."""
    for tb in range(min(T, max_tb), 0, -1):
        if T % tb == 0:
            return tb
    return 1


def _pick_batch_block(B):
    """Split batch into two sublane-aligned blocks when possible so the leading
    'parallel' grid axis can be sharded across TensorCores on v7x."""
    half = B // 2
    if half >= 8 and half % 8 == 0 and B % half == 0:
        return half
    return B


def _pick_row_block(M, max_rows=512):
    """Row-block for the hoisted input-projection matmul."""
    if M <= max_rows:
        return M
    for tm in range(max_rows - max_rows % 8, 7, -8):
        if M % tm == 0:
            return tm
    return M


# -----------------------------------------------------------------------------
# Hoisted input projection: XW = X @ W_ih^T + (b_ih + b_hh), all timesteps.
# -----------------------------------------------------------------------------
def input_proj_kernel(x_ref, wT_ref, b_ref, out_ref):
    out_ref[...] = (
        jnp.dot(x_ref[...], wT_ref[...], preferred_element_type=jnp.float32)
        + b_ref[...]
    )


def input_projection(x_tbf, w_ihT, bias):
    """x_tbf: (T, B, F) f32.  w_ihT: (F, 4H) bf16.  Returns (T, B, 4H) f32."""
    T, B, F = x_tbf.shape
    H4 = w_ihT.shape[1]
    M = T * B
    x2d = x_tbf.reshape(M, F).astype(jnp.bfloat16)   # bf16 MXU operand
    tm = _pick_row_block(M)

    out = pl.pallas_call(
        input_proj_kernel,
        out_shape=jax.ShapeDtypeStruct((M, H4), jnp.float32),
        grid_spec=pltpu.PrefetchScalarGridSpec(
            num_scalar_prefetch=0,
            grid=(M // tm,),
            in_specs=[
                pl.BlockSpec((tm, F), lambda m: (m, 0)),
                pl.BlockSpec((F, H4), lambda m: (0, 0)),
                pl.BlockSpec((1, H4), lambda m: (0, 0)),
            ],
            out_specs=pl.BlockSpec((tm, H4), lambda m: (m, 0)),
        ),
        compiler_params=pltpu.CompilerParams(
            dimension_semantics=("parallel",)),
    )(x2d, w_ihT, bias)
    return out.reshape(T, B, H4)


# -----------------------------------------------------------------------------
# Recurrent LSTM-with-projection kernel (PyTorch proj_size semantics).
# Grid = (batch_blocks [parallel], time_blocks [arbitrary, sequential]).
# h/c persist in VMEM scratch; the per-grid-step inner loop over t_block
# timesteps is fully unrolled (t_block is small and static).
# -----------------------------------------------------------------------------
def lstm_block_kernel(xw_ref, w_hhT_ref, w_hrT_ref, out_ref, h_scr, c_scr,
                      *, hidden, t_block, emit_sequence):
    tb = pl.program_id(1)

    @pl.when(tb == 0)
    def _():
        h_scr[...] = jnp.zeros_like(h_scr)
        c_scr[...] = jnp.zeros_like(c_scr)

    w_hhT = w_hhT_ref[...]          # (P, 4H) bf16, resident
    w_hrT = w_hrT_ref[...]          # (H, P)  bf16, resident
    H = hidden

    h = h_scr[...]                  # (BB, P) f32
    c = c_scr[...]                  # (BB, H) f32

    for l in range(t_block):        # static full unroll of the time block
        gates = xw_ref[l] + jnp.dot(h.astype(jnp.bfloat16), w_hhT,
                                    preferred_element_type=jnp.float32)
        # PyTorch gate order: input, forget, cell(g), output
        i_g = jax.nn.sigmoid(gates[:, 0 * H:1 * H])
        f_g = jax.nn.sigmoid(gates[:, 1 * H:2 * H])
        g_g = jnp.tanh(gates[:, 2 * H:3 * H])
        o_g = jax.nn.sigmoid(gates[:, 3 * H:4 * H])

        c = f_g * c + i_g * g_g                       # (BB, H) f32
        h_tilde = o_g * jnp.tanh(c)                   # (BB, H)
        h = jnp.dot(h_tilde.astype(jnp.bfloat16), w_hrT,   # projection (BB, P)
                    preferred_element_type=jnp.float32)
        if emit_sequence:
            out_ref[l] = h

    h_scr[...] = h
    c_scr[...] = c

    if not emit_sequence:
        # Constant output block index along the time axis -> only the final
        # value is written back to HBM (accumulator pattern); the full
        # (T, B, P) sequence is never materialized.
        out_ref[...] = h


def lstm_recurrent(xw, w_hhT, w_hrT, *, emit_sequence):
    """xw: (T, B, 4H) f32 precomputed input projection (+bias).
    Returns (T, B, P) f32 if emit_sequence else (B, P) f32 (= h at t = T-1)."""
    T, B, H4 = xw.shape
    H = H4 // 4
    P = w_hhT.shape[0]
    TB = _pick_time_block(T)
    BB = _pick_batch_block(B)
    grid = (B // BB, T // TB)

    kern = functools.partial(lstm_block_kernel, hidden=H, t_block=TB,
                             emit_sequence=emit_sequence)

    if emit_sequence:
        out_shape = jax.ShapeDtypeStruct((T, B, P), jnp.float32)
        out_spec = pl.BlockSpec((TB, BB, P), lambda nb, tb: (tb, nb, 0))
    else:
        out_shape = jax.ShapeDtypeStruct((B, P), jnp.float32)
        out_spec = pl.BlockSpec((BB, P), lambda nb, tb: (nb, 0))

    return pl.pallas_call(
        kern,
        out_shape=out_shape,
        grid_spec=pltpu.PrefetchScalarGridSpec(
            num_scalar_prefetch=0,
            grid=grid,
            in_specs=[
                pl.BlockSpec((TB, BB, H4), lambda nb, tb: (tb, nb, 0)),  # xw
                pl.BlockSpec((P, H4), lambda nb, tb: (0, 0)),            # W_hh^T
                pl.BlockSpec((H, P), lambda nb, tb: (0, 0)),             # W_hr^T
            ],
            out_specs=out_spec,
            scratch_shapes=[
                pltpu.VMEM((BB, P), jnp.float32),   # h state (f32)
                pltpu.VMEM((BB, H), jnp.float32),   # c state (f32)
            ],
        ),
        compiler_params=pltpu.CompilerParams(
            dimension_semantics=("parallel", "arbitrary")),
    )(xw, w_hhT, w_hrT)


# -----------------------------------------------------------------------------
# Head: Linear -> ReLU -> L2 normalize along feature dim (torch dim=1).
# -----------------------------------------------------------------------------
def head_kernel(h_ref, wT_ref, b_ref, out_ref):
    z = jnp.dot(h_ref[...].astype(jnp.bfloat16), wT_ref[...],
                preferred_element_type=jnp.float32) + b_ref[...]
    z = jnp.maximum(z, 0.0)                                # ReLU
    sumsq = jnp.sum(z * z, axis=1, keepdims=True)
    # F.normalize(p=2, eps=1e-12): x / max(||x||, eps)  == x * rsqrt(max(ss, eps^2))
    out_ref[...] = z * lax.rsqrt(jnp.maximum(sumsq, 1e-24))


def head(h_last, w_linT, b_lin):
    B, P = h_last.shape
    E = w_linT.shape[1]
    # TODO(synk): E=16 lanes -> masked stores; pad E to 128 for lane-dense
    # stores at production embedding sizes.
    return pl.pallas_call(
        head_kernel,
        out_shape=jax.ShapeDtypeStruct((B, E), jnp.float32),
        in_specs=[
            pl.BlockSpec((B, P), lambda: (0, 0)),
            pl.BlockSpec((P, E), lambda: (0, 0)),
            pl.BlockSpec((1, E), lambda: (0, 0)),
        ],
        out_specs=pl.BlockSpec((B, E), lambda: (0, 0)),
    )(h_last, w_linT, b_lin)


# -----------------------------------------------------------------------------
# Parameter construction (deterministic, mirrors __init__ shapes).
# Weights are stored pre-transposed and in bf16 (MXU operands); biases stay f32.
# -----------------------------------------------------------------------------
def init_params(key, input_size, hidden_size, projection_size, embedding_size,
                num_layers):
    ortho = jax.nn.initializers.orthogonal(scale=3.0)   # gain=3, like _init_weights
    params = {"lstm": []}
    for layer in range(num_layers):
        in_sz = input_size if layer == 0 else projection_size
        key, k1, k2, k3, k4, k5 = jax.random.split(key, 6)
        bound = 1.0 / jnp.sqrt(hidden_size)
        w_ih = ortho(k1, (4 * hidden_size, in_sz), jnp.float32)
        w_hh = ortho(k2, (4 * hidden_size, projection_size), jnp.float32)
        w_hr = ortho(k3, (projection_size, hidden_size), jnp.float32)
        b = (jax.random.uniform(k4, (1, 4 * hidden_size), jnp.float32,
                                -bound, bound)
             + jax.random.uniform(k5, (1, 4 * hidden_size), jnp.float32,
                                  -bound, bound))       # b_ih + b_hh combined
        params["lstm"].append({
            "w_ihT": w_ih.T.astype(jnp.bfloat16),       # (in, 4H)
            "w_hhT": w_hh.T.astype(jnp.bfloat16),       # (P, 4H)
            "w_hrT": w_hr.T.astype(jnp.bfloat16),       # (H, P)
            "b": b,                                     # (1, 4H) f32
        })
    key, k1, k2 = jax.random.split(key, 3)
    lin_w = ortho(k1, (embedding_size, projection_size), jnp.float32)
    bound = 1.0 / jnp.sqrt(projection_size)
    params["linear_wT"] = lin_w.T.astype(jnp.bfloat16)  # (P, E)
    params["linear_b"] = jax.random.uniform(k2, (1, embedding_size),
                                            jnp.float32, -bound, bound)
    # W, B params (GreaterThan0Constraint at init: 10 * clamp(10,-1,1) = 10);
    # unused in forward, kept for completeness.
    params["W"] = jnp.array([10.0], jnp.float32)
    params["B"] = jnp.array([5.0], jnp.float32)
    return params


# -----------------------------------------------------------------------------
# Forward pass (matches SpeakerVerificationLSTMEncoder.forward semantics).
# -----------------------------------------------------------------------------
def forward(x, params):
    """x: (n_speakers, n_utterances, seq_len, input_size) float."""
    n_spk, n_utt, seq_len, feat = x.shape
    batch = n_spk * n_utt

    # x.reshape(-1, T, F).float(), then to time-major (T, B, F)
    seq = x.reshape(batch, seq_len, feat).astype(jnp.float32)
    cur = jnp.transpose(seq, (1, 0, 2))                 # (T, B, F)

    n_layers = len(params["lstm"])
    for li, lp in enumerate(params["lstm"]):
        last = (li == n_layers - 1)
        xw = input_projection(cur, lp["w_ihT"], lp["b"])        # (T, B, 4H)
        cur = lstm_recurrent(xw, lp["w_hhT"], lp["w_hrT"],
                             emit_sequence=not last)
    h_last = cur                                        # == hx[-1], (B, P)

    emb = head(h_last, params["linear_wT"], params["linear_b"])  # (B, E)
    output = emb.reshape(n_spk, n_utt, -1)

    # centroids (torch.no_grad bookkeeping; matches the module verbatim)
    j_i_centroids = (jnp.sum(output, axis=1) / (n_utt - 1)).reshape(n_spk, 1, -1)
    j_k_centroids = jnp.mean(output, axis=1).reshape(n_spk, 1, -1)
    return output, j_i_centroids, j_k_centroids


# TODO(synk): criterion() (GE2E-style cosine-similarity loss with argmax over
# sigmoid scores) and save() (mlflow) are host-side bookkeeping, not part of
# forward; left unimplemented.


if __name__ == "__main__":
    # Small shapes consistent with the module's forward contract.
    n_speakers, n_utterances = 2, 4        # batch = 8
    seq_len, input_size = 8, 16
    hidden_size, projection_size, embedding_size = 32, 16, 16
    num_layers = 2

    key = jax.random.PRNGKey(0)
    key, pk, xk = jax.random.split(key, 3)

    params = init_params(pk, input_size, hidden_size, projection_size,
                         embedding_size, num_layers)
    x = jax.random.normal(
        xk, (n_speakers, n_utterances, seq_len, input_size), jnp.float32)

    fwd = jax.jit(forward)
    output, j_i, j_k = fwd(x, params)
    jax.block_until_ready((output, j_i, j_k))

    assert output.shape == (n_speakers, n_utterances, embedding_size)
    assert j_i.shape == (n_speakers, 1, embedding_size)
    assert j_k.shape == (n_speakers, 1, embedding_size)
    assert bool(jnp.all(jnp.isfinite(output)))
    print("KERNEL_OK")
</pallas_src>

<mosaic_0001>
module attributes {stable_mosaic.version = 11 : i64} {
  func.func @input_proj_kernel(%arg0: i32, %arg1: memref<64x16xbf16, #tpu.memory_space<vmem>>, %arg2: memref<16x128xbf16, #tpu.memory_space<vmem>>, %arg3: memref<1x128xf32, #tpu.memory_space<vmem>>, %arg4: memref<64x128xf32, #tpu.memory_space<vmem>>) attributes {dimension_semantics = [#tpu.dimension_semantics<parallel>], iteration_bounds = array<i64: 1>, scalar_prefetch = 0 : i64, scratch_operands = 0 : i64, tpu.core_type = #tpu.core_type<tc>, window_params = [{transform_indices = @transform_0, window_bounds = array<i64: 64, 16>}, {pipeline_mode = #tpu.pipeline_mode<synchronous>, transform_indices = @transform_1, window_bounds = array<i64: 16, 128>}, {pipeline_mode = #tpu.pipeline_mode<synchronous>, transform_indices = @transform_2, window_bounds = array<i64: 1, 128>}, {transform_indices = @transform_3, window_bounds = array<i64: 64, 128>}]} {
    %c0 = arith.constant 0 : index
    %c0_0 = arith.constant 0 : index
    %0 = vector.load %arg1[%c0, %c0_0] : memref<64x16xbf16, #tpu.memory_space<vmem>>, vector<64x16xbf16>
    %c0_1 = arith.constant 0 : index
    %c0_2 = arith.constant 0 : index
    %1 = vector.load %arg2[%c0_1, %c0_2] : memref<16x128xbf16, #tpu.memory_space<vmem>>, vector<16x128xbf16>
    %cst = arith.constant dense<0.000000e+00> : vector<64x128xf32>
    %2 = tpu.matmul %0, %1, %cst {dimension_numbers = #tpu.dot_dimension_numbers<[1], [0], [0], [1], [0, 0, 1, 1], [], []>} : vector<64x16xbf16>, vector<16x128xbf16>, vector<64x128xf32> -> vector<64x128xf32>
    %c0_3 = arith.constant 0 : index
    %c0_4 = arith.constant 0 : index
    %3 = vector.load %arg3[%c0_3, %c0_4] : memref<1x128xf32, #tpu.memory_space<vmem>>, vector<1x128xf32>
    %4 = vector.broadcast %3 : vector<1x128xf32> to vector<64x128xf32>
    %5 = arith.addf %2, %4 : vector<64x128xf32>
    %c0_5 = arith.constant 0 : index
    %c0_6 = arith.constant 0 : index
    %6 = vector.load %arg4[%c0_5, %c0_6] : memref<64x128xf32, #tpu.memory_space<vmem>>, vector<64x128xf32>
    tpu.vector_store %arg4[%c0_5, %c0_6], %5 {strides = array<i32>} : memref<64x128xf32, #tpu.memory_space<vmem>>, vector<64x128xf32>,
    return
  }
  func.func @transform_0(%arg0: i32) -> (i32, i32) {
    %c0_i32 = arith.constant 0 : i32
    %c0_i32_0 = arith.constant 0 : i32
    return %arg0, %c0_i32 : i32, i32
  }
  func.func @transform_1(%arg0: i32) -> (i32, i32) {
    %c0_i32 = arith.constant 0 : i32
    %c0_i32_0 = arith.constant 0 : i32
    %c0_i32_1 = arith.constant 0 : i32
    return %c0_i32, %c0_i32_0 : i32, i32
  }
  func.func @transform_2(%arg0: i32) -> (i32, i32) {
    %c0_i32 = arith.constant 0 : i32
    %c0_i32_0 = arith.constant 0 : i32
    %c0_i32_1 = arith.constant 0 : i32
    return %c0_i32, %c0_i32_0 : i32, i32
  }
  func.func @transform_3(%arg0: i32) -> (i32, i32) {
    %c0_i32 = arith.constant 0 : i32
    %c0_i32_0 = arith.constant 0 : i32
    return %arg0, %c0_i32 : i32, i32
  }
}

module attributes {stable_mosaic.version = 11 : i64} {
  func.func @head_kernel(%arg0: memref<8x16xf32, #tpu.memory_space<vmem>>, %arg1: memref<16x16xbf16, #tpu.memory_space<vmem>>, %arg2: memref<1x16xf32, #tpu.memory_space<vmem>>, %arg3: memref<8x16xf32, #tpu.memory_space<vmem>>) attributes {dimension_semantics = [], scalar_prefetch = 0 : i64, scratch_operands = 0 : i64, tpu.core_type = #tpu.core_type<tc>} {
    %c0 = arith.constant 0 : index
    %c0_0 = arith.constant 0 : index
    %0 = vector.load %arg0[%c0, %c0_0] : memref<8x16xf32, #tpu.memory_space<vmem>>, vector<8x16xf32>
    %1 = arith.truncf %0 : vector<8x16xf32> to vector<8x16xbf16>
    %c0_1 = arith.constant 0 : index
    %c0_2 = arith.constant 0 : index
    %2 = vector.load %arg1[%c0_1, %c0_2] : memref<16x16xbf16, #tpu.memory_space<vmem>>, vector<16x16xbf16>
    %cst = arith.constant dense<0.000000e+00> : vector<8x16xf32>
    %3 = tpu.matmul %1, %2, %cst {dimension_numbers = #tpu.dot_dimension_numbers<[1], [0], [0], [1], [0, 0, 1, 1], [], []>} : vector<8x16xbf16>, vector<16x16xbf16>, vector<8x16xf32> -> vector<8x16xf32>
    %c0_3 = arith.constant 0 : index
    %c0_4 = arith.constant 0 : index
    %4 = vector.load %arg2[%c0_3, %c0_4] : memref<1x16xf32, #tpu.memory_space<vmem>>, vector<1x16xf32>
    %5 = vector.broadcast %4 : vector<1x16xf32> to vector<8x16xf32>
    %6 = arith.addf %3, %5 : vector<8x16xf32>
    %cst_5 = arith.constant 0.000000e+00 : f32
    %7 = vector.broadcast %cst_5 : f32 to vector<8x16xf32>
    %8 = arith.maximumf %6, %7 : vector<8x16xf32>
    %9 = arith.mulf %8, %8 : vector<8x16xf32>
    %cst_6 = arith.constant dense<0.000000e+00> : vector<8xf32>
    %10 = vector.multi_reduction <add>, %9, %cst_6 [1] : vector<8x16xf32> to vector<8xf32>
    %11 = vector.shape_cast %10 : vector<8xf32> to vector<8x1xf32>
    %cst_7 = arith.constant 1.000000e-24 : f32
    %12 = vector.broadcast %cst_7 : f32 to vector<8x1xf32>
    %13 = arith.maximumf %11, %12 : vector<8x1xf32>
    %14 = math.rsqrt %13 : vector<8x1xf32>
    %15 = vector.broadcast %14 : vector<8x1xf32> to vector<8x16xf32>
    %16 = arith.mulf %8, %15 : vector<8x16xf32>
    %c0_8 = arith.constant 0 : index
    %c0_9 = arith.constant 0 : index
    %17 = vector.load %arg3[%c0_8, %c0_9] : memref<8x16xf32, #tpu.memory_space<vmem>>, vector<8x16xf32>
    tpu.vector_store %arg3[%c0_8, %c0_9], %16 {strides = array<i32>} : memref<8x16xf32, #tpu.memory_space<vmem>>, vector<8x16xf32>,
    return
  }
}

module attributes {stable_mosaic.version = 11 : i64} {
  func.func @lstm_block_kernel(%arg0: i32, %arg1: i32, %arg2: memref<8x8x128xf32, #tpu.memory_space<vmem>>, %arg3: memref<16x128xbf16, #tpu.memory_space<vmem>>, %arg4: memref<32x16xbf16, #tpu.memory_space<vmem>>, %arg5: memref<8x8x16xf32, #tpu.memory_space<vmem>>, %arg6: memref<8x16xf32, #tpu.memory_space<vmem>>, %arg7: memref<8x32xf32, #tpu.memory_space<vmem>>) attributes {dimension_semantics = [#tpu.dimension_semantics<parallel>, #tpu.dimension_semantics<arbitrary>], iteration_bounds = array<i64: 1, 1>, scalar_prefetch = 0 : i64, scratch_operands = 2 : i64, tpu.core_type = #tpu.core_type<tc>, window_params = [{transform_indices = @transform_0, window_bounds = array<i64: 8, 8, 128>}, {pipeline_mode = #tpu.pipeline_mode<synchronous>, transform_indices = @transform_1, window_bounds = array<i64: 16, 128>}, {pipeline_mode = #tpu.pipeline_mode<synchronous>, transform_indices = @transform_2, window_bounds = array<i64: 32, 16>}, {transform_indices = @transform_3, window_bounds = array<i64: 8, 8, 16>}]} {
    %c0_i32 = arith.constant 0 : i32
    %0 = arith.cmpi eq, %arg1, %c0_i32 : i32
    %1 = arith.extui %0 : i1 to i32
    %c0_i32_0 = arith.constant 0 : i32
    %2 = arith.cmpi ne, %1, %c0_i32_0 : i32
    scf.if %2 {
      %cst_92 = arith.constant 0.000000e+00 : f32
      %289 = vector.broadcast %cst_92 : f32 to vector<8x16xf32>
      %c0_93 = arith.constant 0 : index
      %c0_94 = arith.constant 0 : index
      %290 = vector.load %arg6[%c0_93, %c0_94] : memref<8x16xf32, #tpu.memory_space<vmem>>, vector<8x16xf32>
      tpu.vector_store %arg6[%c0_93, %c0_94], %289 {strides = array<i32>} : memref<8x16xf32, #tpu.memory_space<vmem>>, vector<8x16xf32>,
      %cst_95 = arith.constant 0.000000e+00 : f32
      %291 = vector.broadcast %cst_95 : f32 to vector<8x32xf32>
      %c0_96 = arith.constant 0 : index
      %c0_97 = arith.constant 0 : index
      %292 = vector.load %arg7[%c0_96, %c0_97] : memref<8x32xf32, #tpu.memory_space<vmem>>, vector<8x32xf32>
      tpu.vector_store %arg7[%c0_96, %c0_97], %291 {strides = array<i32>} : memref<8x32xf32, #tpu.memory_space<vmem>>, vector<8x32xf32>,
    } else {
    }
    %c0 = arith.constant 0 : index
    %c0_1 = arith.constant 0 : index
    %3 = vector.load %arg3[%c0, %c0_1] : memref<16x128xbf16, #tpu.memory_space<vmem>>, vector<16x128xbf16>
    %c0_2 = arith.constant 0 : index
    %c0_3 = arith.constant 0 : index
    %4 = vector.load %arg4[%c0_2, %c0_3] : memref<32x16xbf16, #tpu.memory_space<vmem>>, vector<32x16xbf16>
    %c0_4 = arith.constant 0 : index
    %c0_5 = arith.constant 0 : index
    %5 = vector.load %arg6[%c0_4, %c0_5] : memref<8x16xf32, #tpu.memory_space<vmem>>, vector<8x16xf32>
    %c0_6 = arith.constant 0 : index
    %c0_7 = arith.constant 0 : index
    %6 = vector.load %arg7[%c0_6, %c0_7] : memref<8x32xf32, #tpu.memory_space<vmem>>, vector<8x32xf32>
    %c0_8 = arith.constant 0 : index
    %c0_9 = arith.constant 0 : index
    %c0_10 = arith.constant 0 : index
    %7 = vector.load %arg2[%c0_8, %c0_9, %c0_10] : memref<8x8x128xf32, #tpu.memory_space<vmem>>, vector<1x8x128xf32>
    %8 = vector.shape_cast %7 : vector<1x8x128xf32> to vector<8x128xf32>
    %9 = arith.truncf %5 : vector<8x16xf32> to vector<8x16xbf16>
    %cst = arith.constant dense<0.000000e+00> : vector<8x128xf32>
    %10 = tpu.matmul %9, %3, %cst {dimension_numbers = #tpu.dot_dimension_numbers<[1], [0], [0], [1], [0, 0, 1, 1], [], []>} : vector<8x16xbf16>, vector<16x128xbf16>, vector<8x128xf32> -> vector<8x128xf32>
    %11 = arith.addf %8, %10 : vector<8x128xf32>
    %12 = vector.extract_strided_slice %11 {offsets = [0, 0], sizes = [8, 32], strides = [1, 1]} : vector<8x128xf32> to vector<8x32xf32>
    %13 = arith.negf %12 : vector<8x32xf32>
    %14 = math.exp %13 : vector<8x32xf32>
    %cst_11 = arith.constant 1.000000e+00 : f32
    %15 = vector.broadcast %cst_11 : f32 to vector<8x32xf32>
    %16 = arith.addf %15, %14 : vector<8x32xf32>
    %17 = arith.divf %15, %16 : vector<8x32xf32>
    %18 = vector.extract_strided_slice %11 {offsets = [0, 32], sizes = [8, 32], strides = [1, 1]} : vector<8x128xf32> to vector<8x32xf32>
    %19 = arith.negf %18 : vector<8x32xf32>
    %20 = math.exp %19 : vector<8x32xf32>
    %cst_12 = arith.constant 1.000000e+00 : f32
    %21 = vector.broadcast %cst_12 : f32 to vector<8x32xf32>
    %22 = arith.addf %21, %20 : vector<8x32xf32>
    %23 = arith.divf %21, %22 : vector<8x32xf32>
    %24 = vector.extract_strided_slice %11 {offsets = [0, 64], sizes = [8, 32], strides = [1, 1]} : vector<8x128xf32> to vector<8x32xf32>
    %25 = math.tanh %24 : vector<8x32xf32>
    %26 = vector.extract_strided_slice %11 {offsets = [0, 96], sizes = [8, 32], strides = [1, 1]} : vector<8x128xf32> to vector<8x32xf32>
    %27 = arith.negf %26 : vector<8x32xf32>
    %28 = math.exp %27 : vector<8x32xf32>
    %cst_13 = arith.constant 1.000000e+00 : f32
    %29 = vector.broadcast %cst_13 : f32 to vector<8x32xf32>
    %30 = arith.addf %29, %28 : vector<8x32xf32>
    %31 = arith.divf %29, %30 : vector<8x32xf32>
    %32 = arith.mulf %23, %6 : vector<8x32xf32>
    %33 = arith.mulf %17, %25 : vector<8x32xf32>
    %34 = arith.addf %32, %33 : vector<8x32xf32>
    %35 = math.tanh %34 : vector<8x32xf32>
    %36 = arith.mulf %31, %35 : vector<8x32xf32>
    %37 = arith.truncf %36 : vector<8x32xf32> to vector<8x32xbf16>
    %cst_14 = arith.constant dense<0.000000e+00> : vector<8x16xf32>
    %38 = tpu.matmul %37, %4, %cst_14 {dimension_numbers = #tpu.dot_dimension_numbers<[1], [0], [0], [1], [0, 0, 1, 1], [], []>} : vector<8x32xbf16>, vector<32x16xbf16>, vector<8x16xf32> -> vector<8x16xf32>
    %c0_15 = arith.constant 0 : index
    %c0_16 = arith.constant 0 : index
    %c0_17 = arith.constant 0 : index
    %39 = vector.load %arg5[%c0_15, %c0_16, %c0_17] : memref<8x8x16xf32, #tpu.memory_space<vmem>>, vector<1x8x16xf32>
    %40 = vector.shape_cast %39 : vector<1x8x16xf32> to vector<8x16xf32>
    %41 = vector.shape_cast %38 : vector<8x16xf32> to vector<1x8x16xf32>
    tpu.vector_store %arg5[%c0_15, %c0_16, %c0_17], %41 {strides = array<i32>} : memref<8x8x16xf32, #tpu.memory_space<vmem>>, vector<1x8x16xf32>,
    %c1 = arith.constant 1 : index
    %c0_18 = arith.constant 0 : index
    %c0_19 = arith.constant 0 : index
    %42 = vector.load %arg2[%c1, %c0_18, %c0_19] : memref<8x8x128xf32, #tpu.memory_space<vmem>>, vector<1x8x128xf32>
    %43 = vector.shape_cast %42 : vector<1x8x128xf32> to vector<8x128xf32>
    %44 = arith.truncf %38 : vector<8x16xf32> to vector<8x16xbf16>
    %cst_20 = arith.constant dense<0.000000e+00> : vector<8x128xf32>
    %45 = tpu.matmul %44, %3, %cst_20 {dimension_numbers = #tpu.dot_dimension_numbers<[1], [0], [0], [1], [0, 0, 1, 1], [], []>} : vector<8x16xbf16>, vector<16x128xbf16>, vector<8x128xf32> -> vector<8x128xf32>
    %46 = arith.addf %43, %45 : vector<8x128xf32>
    %47 = vector.extract_strided_slice %46 {offsets = [0, 0], sizes = [8, 32], strides = [1, 1]} : vector<8x128xf32> to vector<8x32xf32>
    %48 = arith.negf %47 : vector<8x32xf32>
    %49 = math.exp %48 : vector<8x32xf32>
    %cst_21 = arith.constant 1.000000e+00 : f32
    %50 = vector.broadcast %cst_21 : f32 to vector<8x32xf32>
    %51 = arith.addf %50, %49 : vector<8x32xf32>
    %52 = arith.divf %50, %51 : vector<8x32xf32>
    %53 = vector.extract_strided_slice %46 {offsets = [0, 32], sizes = [8, 32], strides = [1, 1]} : vector<8x128xf32> to vector<8x32xf32>
    %54 = arith.negf %53 : vector<8x32xf32>
    %55 = math.exp %54 : vector<8x32xf32>
    %cst_22 = arith.constant 1.000000e+00 : f32
    %56 = vector.broadcast %cst_22 : f32 to vector<8x32xf32>
    %57 = arith.addf %56, %55 : vector<8x32xf32>
    %58 = arith.divf %56, %57 : vector<8x32xf32>
    %59 = vector.extract_strided_slice %46 {offsets = [0, 64], sizes = [8, 32], strides = [1, 1]} : vector<8x128xf32> to vector<8x32xf32>
    %60 = math.tanh %59 : vector<8x32xf32>
    %61 = vector.extract_strided_slice %46 {offsets = [0, 96], sizes = [8, 32], strides = [1, 1]} : vector<8x128xf32> to vector<8x32xf32>
    %62 = arith.negf %61 : vector<8x32xf32>
    %63 = math.exp %62 : vector<8x32xf32>
    %cst_23 = arith.constant 1.000000e+00 : f32
    %64 = vector.broadcast %cst_23 : f32 to vector<8x32xf32>
    %65 = arith.addf %64, %63 : vector<8x32xf32>
    %66 = arith.divf %64, %65 : vector<8x32xf32>
    %67 = arith.mulf %58, %34 : vector<8x32xf32>
    %68 = arith.mulf %52, %60 : vector<8x32xf32>
    %69 = arith.addf %67, %68 : vector<8x32xf32>
    %70 = math.tanh %69 : vector<8x32xf32>
    %71 = arith.mulf %66, %70 : vector<8x32xf32>
    %72 = arith.truncf %71 : vector<8x32xf32> to vector<8x32xbf16>
    %cst_24 = arith.constant dense<0.000000e+00> : vector<8x16xf32>
    %73 = tpu.matmul %72, %4, %cst_24 {dimension_numbers = #tpu.dot_dimension_numbers<[1], [0], [0], [1], [0, 0, 1, 1], [], []>} : vector<8x32xbf16>, vector<32x16xbf16>, vector<8x16xf32> -> vector<8x16xf32>
    %c1_25 = arith.constant 1 : index
    %c0_26 = arith.constant 0 : index
    %c0_27 = arith.constant 0 : index
    %74 = vector.load %arg5[%c1_25, %c0_26, %c0_27] : memref<8x8x16xf32, #tpu.memory_space<vmem>>, vector<1x8x16xf32>
    %75 = vector.shape_cast %74 : vector<1x8x16xf32> to vector<8x16xf32>
    %76 = vector.shape_cast %73 : vector<8x16xf32> to vector<1x8x16xf32>
    tpu.vector_store %arg5[%c1_25, %c0_26, %c0_27], %76 {strides = array<i32>} : memref<8x8x16xf32, #tpu.memory_space<vmem>>, vector<1x8x16xf32>,
    %c2 = arith.constant 2 : index
    %c0_28 = arith.constant 0 : index
    %c0_29 = arith.constant 0 : index
    %77 = vector.load %arg2[%c2, %c0_28, %c0_29] : memref<8x8x128xf32, #tpu.memory_space<vmem>>, vector<1x8x128xf32>
    %78 = vector.shape_cast %77 : vector<1x8x128xf32> to vector<8x128xf32>
    %79 = arith.truncf %73 : vector<8x16xf32> to vector<8x16xbf16>
    %cst_30 = arith.constant dense<0.000000e+00> : vector<8x128xf32>
    %80 = tpu.matmul %79, %3, %cst_30 {dimension_numbers = #tpu.dot_dimension_numbers<[1], [0], [0], [1], [0, 0, 1, 1], [], []>} : vector<8x16xbf16>, vector<16x128xbf16>, vector<8x128xf32> -> vector<8x128xf32>
    %81 = arith.addf %78, %80 : vector<8x128xf32>
    %82 = vector.extract_strided_slice %81 {offsets = [0, 0], sizes = [8, 32], strides = [1, 1]} : vector<8x128xf32> to vector<8x32xf32>
    %83 = arith.negf %82 : vector<8x32xf32>
    %84 = math.exp %83 : vector<8x32xf32>
    %cst_31 = arith.constant 1.000000e+00 : f32
    %85 = vector.broadcast %cst_31 : f32 to vector<8x32xf32>
    %86 = arith.addf %85, %84 : vector<8x32xf32>
    %87 = arith.divf %85, %86 : vector<8x32xf32>
    %88 = vector.extract_strided_slice %81 {offsets = [0, 32], sizes = [8, 32], strides = [1, 1]} : vector<8x128xf32> to vector<8x32xf32>
    %89 = arith.negf %88 : vector<8x32xf32>
    %90 = math.exp %89 : vector<8x32xf32>
    %cst_32 = arith.constant 1.000000e+00 : f32
    %91 = vector.broadcast %cst_32 : f32 to vector<8x32xf32>
    %92 = arith.addf %91, %90 : vector<8x32xf32>
    %93 = arith.divf %91, %92 : vector<8x32xf32>
    %94 = vector.extract_strided_slice %81 {offsets = [0, 64], sizes = [8, 32], strides = [1, 1]} : vector<8x128xf32> to vector<8x32xf32>
    %95 = math.tanh %94 : vector<8x32xf32>
    %96 = vector.extract_strided_slice %81 {offsets = [0, 96], sizes = [8, 32], strides = [1, 1]} : vector<8x128xf32> to vector<8x32xf32>
    %97 = arith.negf %96 : vector<8x32xf32>
    %98 = math.exp %97 : vector<8x32xf32>
    %cst_33 = arith.constant 1.000000e+00 : f32
    %99 = vector.broadcast %cst_33 : f32 to vector<8x32xf32>
    %100 = arith.addf %99, %98 : vector<8x32xf32>
    %101 = arith.divf %99, %100 : vector<8x32xf32>
    %102 = arith.mulf %93, %69 : vector<8x32xf32>
    %103 = arith.mulf %87, %95 : vector<8x32xf32>
    %104 = arith.addf %102, %103 : vector<8x32xf32>
    %105 = math.tanh %104 : vector<8x32xf32>
    %106 = arith.mulf %101, %105 : vector<8x32xf32>
    %107 = arith.truncf %106 : vector<8x32xf32> to vector<8x32xbf16>
    %cst_34 = arith.constant dense<0.000000e+00> : vector<8x16xf32>
    %108 = tpu.matmul %107, %4, %cst_34 {dimension_numbers = #tpu.dot_dimension_numbers<[1], [0], [0], [1], [0, 0, 1, 1], [], []>} : vector<8x32xbf16>, vector<32x16xbf16>, vector<8x16xf32> -> vector<8x16xf32>
    %c2_35 = arith.constant 2 : index
    %c0_36 = arith.constant 0 : index
    %c0_37 = arith.constant 0 : index
    %109 = vector.load %arg5[%c2_35, %c0_36, %c0_37] : memref<8x8x16xf32, #tpu.memory_space<vmem>>, vector<1x8x16xf32>
    %110 = vector.shape_cast %109 : vector<1x8x16xf32> to vector<8x16xf32>
    %111 = vector.shape_cast %108 : vector<8x16xf32> to vector<1x8x16xf32>
    tpu.vector_store %arg5[%c2_35, %c0_36, %c0_37], %111 {strides = array<i32>} : memref<8x8x16xf32, #tpu.memory_space<vmem>>, vector<1x8x16xf32>,
    %c3 = arith.constant 3 : index
    %c0_38 = arith.constant 0 : index
    %c0_39 = arith.constant 0 : index
    %112 = vector.load %arg2[%c3, %c0_38, %c0_39] : memref<8x8x128xf32, #tpu.memory_space<vmem>>, vector<1x8x128xf32>
    %113 = vector.shape_cast %112 : vector<1x8x128xf32> to vector<8x128xf32>
    %114 = arith.truncf %108 : vector<8x16xf32> to vector<8x16xbf16>
    %cst_40 = arith.constant dense<0.000000e+00> : vector<8x128xf32>
    %115 = tpu.matmul %114, %3, %cst_40 {dimension_numbers = #tpu.dot_dimension_numbers<[1], [0], [0], [1], [0, 0, 1, 1], [], []>} : vector<8x16xbf16>, vector<16x128xbf16>, vector<8x128xf32> -> vector<8x128xf32>
    %116 = arith.addf %113, %115 : vector<8x128xf32>
    %117 = vector.extract_strided_slice %116 {offsets = [0, 0], sizes = [8, 32], strides = [1, 1]} : vector<8x128xf32> to vector<8x32xf32>
    %118 = arith.negf %117 : vector<8x32xf32>
    %119 = math.exp %118 : vector<8x32xf32>
    %cst_41 = arith.constant 1.000000e+00 : f32
    %120 = vector.broadcast %cst_41 : f32 to vector<8x32xf32>
    %121 = arith.addf %120, %119 : vector<8x32xf32>
    %122 = arith.divf %120, %121 : vector<8x32xf32>
    %123 = vector.extract_strided_slice %116 {offsets = [0, 32], sizes = [8, 32], strides = [1, 1]} : vector<8x128xf32> to vector<8x32xf32>
    %124 = arith.negf %123 : vector<8x32xf32>
    %125 = math.exp %124 : vector<8x32xf32>
    %cst_42 = arith.constant 1.000000e+00 : f32
    %126 = vector.broadcast %cst_42 : f32 to vector<8x32xf32>
    %127 = arith.addf %126, %125 : vector<8x32xf32>
    %128 = arith.divf %126, %127 : vector<8x32xf32>
    %129 = vector.extract_strided_slice %116 {offsets = [0, 64], sizes = [8, 32], strides = [1, 1]} : vector<8x128xf32> to vector<8x32xf32>
    %130 = math.tanh %129 : vector<8x32xf32>
    %131 = vector.extract_strided_slice %116 {offsets = [0, 96], sizes = [8, 32], strides = [1, 1]} : vector<8x128xf32> to vector<8x32xf32>
    %132 = arith.negf %131 : vector<8x32xf32>
    %133 = math.exp %132 : vector<8x32xf32>
    %cst_43 = arith.constant 1.000000e+00 : f32
    %134 = vector.broadcast %cst_43 : f32 to vector<8x32xf32>
    %135 = arith.addf %134, %133 : vector<8x32xf32>
    %136 = arith.divf %134, %135 : vector<8x32xf32>
    %137 = arith.mulf %128, %104 : vector<8x32xf32>
    %138 = arith.mulf %122, %130 : vector<8x32xf32>
    %139 = arith.addf %137, %138 : vector<8x32xf32>
    %140 = math.tanh %139 : vector<8x32xf32>
    %141 = arith.mulf %136, %140 : vector<8x32xf32>
    %142 = arith.truncf %141 : vector<8x32xf32> to vector<8x32xbf16>
    %cst_44 = arith.constant dense<0.000000e+00> : vector<8x16xf32>
    %143 = tpu.matmul %142, %4, %cst_44 {dimension_numbers = #tpu.dot_dimension_numbers<[1], [0], [0], [1], [0, 0, 1, 1], [], []>} : vector<8x32xbf16>, vector<32x16xbf16>, vector<8x16xf32> -> vector<8x16xf32>
    %c3_45 = arith.constant 3 : index
    %c0_46 = arith.constant 0 : index
    %c0_47 = arith.constant 0 : index
    %144 = vector.load %arg5[%c3_45, %c0_46, %c0_47] : memref<8x8x16xf32, #tpu.memory_space<vmem>>, vector<1x8x16xf32>
    %145 = vector.shape_cast %144 : vector<1x8x16xf32> to vector<8x16xf32>
    %146 = vector.shape_cast %143 : vector<8x16xf32> to vector<1x8x16xf32>
    tpu.vector_store %arg5[%c3_45, %c0_46, %c0_47], %146 {strides = array<i32>} : memref<8x8x16xf32, #tpu.memory_space<vmem>>, vector<1x8x16xf32>,
    %c4 = arith.constant 4 : index
    %c0_48 = arith.constant 0 : index
    %c0_49 = arith.constant 0 : index
    %147 = vector.load %arg2[%c4, %c0_48, %c0_49] : memref<8x8x128xf32, #tpu.memory_space<vmem>>, vector<1x8x128xf32>
    %148 = vector.shape_cast %147 : vector<1x8x128xf32> to vector<8x128xf32>
    %149 = arith.truncf %143 : vector<8x16xf32> to vector<8x16xbf16>
    %cst_50 = arith.constant dense<0.000000e+00> : vector<8x128xf32>
    %150 = tpu.matmul %149, %3, %cst_50 {dimension_numbers = #tpu.dot_dimension_numbers<[1], [0], [0], [1], [0, 0, 1, 1], [], []>} : vector<8x16xbf16>, vector<16x128xbf16>, vector<8x128xf32> -> vector<8x128xf32>
    %151 = arith.addf %148, %150 : vector<8x128xf32>
    %152 = vector.extract_strided_slice %151 {offsets = [0, 0], sizes = [8, 32], strides = [1, 1]} : vector<8x128xf32> to vector<8x32xf32>
    %153 = arith.negf %152 : vector<8x32xf32>
    %154 = math.exp %153 : vector<8x32xf32>
    %cst_51 = arith.constant 1.000000e+00 : f32
    %155 = vector.broadcast %cst_51 : f32 to vector<8x32xf32>
    %156 = arith.addf %155, %154 : vector<8x32xf32>
    %157 = arith.divf %155, %156 : vector<8x32xf32>
    %158 = vector.extract_strided_slice %151 {offsets = [0, 32], sizes = [8, 32], strides = [1, 1]} : vector<8x128xf32> to vector<8x32xf32>
    %159 = arith.negf %158 : vector<8x32xf32>
    %160 = math.exp %159 : vector<8x32xf32>
    %cst_52 = arith.constant 1.000000e+00 : f32
    %161 = vector.broadcast %cst_52 : f32 to vector<8x32xf32>
    %162 = arith.addf %161, %160 : vector<8x32xf32>
    %163 = arith.divf %161, %162 : vector<8x32xf32>
    %164 = vector.extract_strided_slice %151 {offsets = [0, 64], sizes = [8, 32], strides = [1, 1]} : vector<8x128xf32> to vector<8x32xf32>
    %165 = math.tanh %164 : vector<8x32xf32>
    %166 = vector.extract_strided_slice %151 {offsets = [0, 96], sizes = [8, 32], strides = [1, 1]} : vector<8x128xf32> to vector<8x32xf32>
    %167 = arith.negf %166 : vector<8x32xf32>
    %168 = math.exp %167 : vector<8x32xf32>
    %cst_53 = arith.constant 1.000000e+00 : f32
    %169 = vector.broadcast %cst_53 : f32 to vector<8x32xf32>
    %170 = arith.addf %169, %168 : vector<8x32xf32>
    %171 = arith.divf %169, %170 : vector<8x32xf32>
    %172 = arith.mulf %163, %139 : vector<8x32xf32>
    %173 = arith.mulf %157, %165 : vector<8x32xf32>
    %174 = arith.addf %172, %173 : vector<8x32xf32>
    %175 = math.tanh %174 : vector<8x32xf32>
    %176 = arith.mulf %171, %175 : vector<8x32xf32>
    %177 = arith.truncf %176 : vector<8x32xf32> to vector<8x32xbf16>
    %cst_54 = arith.constant dense<0.000000e+00> : vector<8x16xf32>
    %178 = tpu.matmul %177, %4, %cst_54 {dimension_numbers = #tpu.dot_dimension_numbers<[1], [0], [0], [1], [0, 0, 1, 1], [], []>} : vector<8x32xbf16>, vector<32x16xbf16>, vector<8x16xf32> -> vector<8x16xf32>
    %c4_55 = arith.constant 4 : index
    %c0_56 = arith.constant 0 : index
    %c0_57 = arith.constant 0 : index
    %179 = vector.load %arg5[%c4_55, %c0_56, %c0_57] : memref<8x8x16xf32, #tpu.memory_space<vmem>>, vector<1x8x16xf32>
    %180 = vector.shape_cast %179 : vector<1x8x16xf32> to vector<8x16xf32>
    %181 = vector.shape_cast %178 : vector<8x16xf32> to vector<1x8x16xf32>
    tpu.vector_store %arg5[%c4_55, %c0_56, %c0_57], %181 {strides = array<i32>} : memref<8x8x16xf32, #tpu.memory_space<vmem>>, vector<1x8x16xf32>,
    %c5 = arith.constant 5 : index
    %c0_58 = arith.constant 0 : index
    %c0_59 = arith.constant 0 : index
    %182 = vector.load %arg2[%c5, %c0_58, %c0_59] : memref<8x8x128xf32, #tpu.memory_space<vmem>>, vector<1x8x128xf32>
    %183 = vector.shape_cast %182 : vector<1x8x128xf32> to vector<8x128xf32>
    %184 = arith.truncf %178 : vector<8x16xf32> to vector<8x16xbf16>
    %cst_60 = arith.constant dense<0.000000e+00> : vector<8x128xf32>
    %185 = tpu.matmul %184, %3, %cst_60 {dimension_numbers = #tpu.dot_dimension_numbers<[1], [0], [0], [1], [0, 0, 1, 1], [], []>} : vector<8x16xbf16>, vector<16x128xbf16>, vector<8x128xf32> -> vector<8x128xf32>
    %186 = arith.addf %183, %185 : vector<8x128xf32>
    %187 = vector.extract_strided_slice %186 {offsets = [0, 0], sizes = [8, 32], strides = [1, 1]} : vector<8x128xf32> to vector<8x32xf32>
    %188 = arith.negf %187 : vector<8x32xf32>
    %189 = math.exp %188 : vector<8x32xf32>
    %cst_61 = arith.constant 1.000000e+00 : f32
    %190 = vector.broadcast %cst_61 : f32 to vector<8x32xf32>
    %191 = arith.addf %190, %189 : vector<8x32xf32>
    %192 = arith.divf %190, %191 : vector<8x32xf32>
    %193 = vector.extract_strided_slice %186 {offsets = [0, 32], sizes = [8, 32], strides = [1, 1]} : vector<8x128xf32> to vector<8x32xf32>
    %194 = arith.negf %193 : vector<8x32xf32>
    %195 = math.exp %194 : vector<8x32xf32>
    %cst_62 = arith.constant 1.000000e+00 : f32
    %196 = vector.broadcast %cst_62 : f32 to vector<8x32xf32>
    %197 = arith.addf %196, %195 : vector<8x32xf32>
    %198 = arith.divf %196, %197 : vector<8x32xf32>
    %199 = vector.extract_strided_slice %186 {offsets = [0, 64], sizes = [8, 32], strides = [1, 1]} : vector<8x128xf32> to vector<8x32xf32>
    %200 = math.tanh %199 : vector<8x32xf32>
    %201 = vector.extract_strided_slice %186 {offsets = [0, 96], sizes = [8, 32], strides = [1, 1]} : vector<8x128xf32> to vector<8x32xf32>
    %202 = arith.negf %201 : vector<8x32xf32>
    %203 = math.exp %202 : vector<8x32xf32>
    %cst_63 = arith.constant 1.000000e+00 : f32
    %204 = vector.broadcast %cst_63 : f32 to vector<8x32xf32>
    %205 = arith.addf %204, %203 : vector<8x32xf32>
    %206 = arith.divf %204, %205 : vector<8x32xf32>
    %207 = arith.mulf %198, %174 : vector<8x32xf32>
    %208 = arith.mulf %192, %200 : vector<8x32xf32>
    %209 = arith.addf %207, %208 : vector<8x32xf32>
    %210 = math.tanh %209 : vector<8x32xf32>
    %211 = arith.mulf %206, %210 : vector<8x32xf32>
    %212 = arith.truncf %211 : vector<8x32xf32> to vector<8x32xbf16>
    %cst_64 = arith.constant dense<0.000000e+00> : vector<8x16xf32>
    %213 = tpu.matmul %212, %4, %cst_64 {dimension_numbers = #tpu.dot_dimension_numbers<[1], [0], [0], [1], [0, 0, 1, 1], [], []>} : vector<8x32xbf16>, vector<32x16xbf16>, vector<8x16xf32> -> vector<8x16xf32>
    %c5_65 = arith.constant 5 : index
    %c0_66 = arith.constant 0 : index
    %c0_67 = arith.constant 0 : index
    %214 = vector.load %arg5[%c5_65, %c0_66, %c0_67] : memref<8x8x16xf32, #tpu.memory_space<vmem>>, vector<1x8x16xf32>
    %215 = vector.shape_cast %214 : vector<1x8x16xf32> to vector<8x16xf32>
    %216 = vector.shape_cast %213 : vector<8x16xf32> to vector<1x8x16xf32>
    tpu.vector_store %arg5[%c5_65, %c0_66, %c0_67], %216 {strides = array<i32>} : memref<8x8x16xf32, #tpu.memory_space<vmem>>, vector<1x8x16xf32>,
    %c6 = arith.constant 6 : index
    %c0_68 = arith.constant 0 : index
    %c0_69 = arith.constant 0 : index
    %217 = vector.load %arg2[%c6, %c0_68, %c0_69] : memref<8x8x128xf32, #tpu.memory_space<vmem>>, vector<1x8x128xf32>
    %218 = vector.shape_cast %217 : vector<1x8x128xf32> to vector<8x128xf32>
    %219 = arith.truncf %213 : vector<8x16xf32> to vector<8x16xbf16>
    %cst_70 = arith.constant dense<0.000000e+00> : vector<8x128xf32>
    %220 = tpu.matmul %219, %3, %cst_70 {dimension_numbers = #tpu.dot_dimension_numbers<[1], [0], [0], [1], [0, 0, 1, 1], [], []>} : vector<8x16xbf16>, vector<16x128xbf16>, vector<8x128xf32> -> vector<8x128xf32>
    %221 = arith.addf %218, %220 : vector<8x128xf32>
    %222 = vector.extract_strided_slice %221 {offsets = [0, 0], sizes = [8, 32], strides = [1, 1]} : vector<8x128xf32> to vector<8x32xf32>
    %223 = arith.negf %222 : vector<8x32xf32>
    %224 = math.exp %223 : vector<8x32xf32>
    %cst_71 = arith.constant 1.000000e+00 : f32
    %225 = vector.broadcast %cst_71 : f32 to vector<8x32xf32>
    %226 = arith.addf %225, %224 : vector<8x32xf32>
    %227 = arith.divf %225, %226 : vector<8x32xf32>
    %228 = vector.extract_strided_slice %221 {offsets = [0, 32], sizes = [8, 32], strides = [1, 1]} : vector<8x128xf32> to vector<8x32xf32>
    %229 = arith.negf %228 : vector<8x32xf32>
    %230 = math.exp %229 : vector<8x32xf32>
    %cst_72 = arith.constant 1.000000e+00 : f32
    %231 = vector.broadcast %cst_72 : f32 to vector<8x32xf32>
    %232 = arith.addf %231, %230 : vector<8x32xf32>
    %233 = arith.divf %231, %232 : vector<8x32xf32>
    %234 = vector.extract_strided_slice %221 {offsets = [0, 64], sizes = [8, 32], strides = [1, 1]} : vector<8x128xf32> to vector<8x32xf32>
    %235 = math.tanh %234 : vector<8x32xf32>
    %236 = vector.extract_strided_slice %221 {offsets = [0, 96], sizes = [8, 32], strides = [1, 1]} : vector<8x128xf32> to vector<8x32xf32>
    %237 = arith.negf %236 : vector<8x32xf32>
    %238 = math.exp %237 : vector<8x32xf32>
    %cst_73 = arith.constant 1.000000e+00 : f32
    %239 = vector.broadcast %cst_73 : f32 to vector<8x32xf32>
    %240 = arith.addf %239, %238 : vector<8x32xf32>
    %241 = arith.divf %239, %240 : vector<8x32xf32>
    %242 = arith.mulf %233, %209 : vector<8x32xf32>
    %243 = arith.mulf %227, %235 : vector<8x32xf32>
    %244 = arith.addf %242, %243 : vector<8x32xf32>
    %245 = math.tanh %244 : vector<8x32xf32>
    %246 = arith.mulf %241, %245 : vector<8x32xf32>
    %247 = arith.truncf %246 : vector<8x32xf32> to vector<8x32xbf16>
    %cst_74 = arith.constant dense<0.000000e+00> : vector<8x16xf32>
    %248 = tpu.matmul %247, %4, %cst_74 {dimension_numbers = #tpu.dot_dimension_numbers<[1], [0], [0], [1], [0, 0, 1, 1], [], []>} : vector<8x32xbf16>, vector<32x16xbf16>, vector<8x16xf32> -> vector<8x16xf32>
    %c6_75 = arith.constant 6 : index
    %c0_76 = arith.constant 0 : index
    %c0_77 = arith.constant 0 : index
    %249 = vector.load %arg5[%c6_75, %c0_76, %c0_77] : memref<8x8x16xf32, #tpu.memory_space<vmem>>, vector<1x8x16xf32>
    %250 = vector.shape_cast %249 : vector<1x8x16xf32> to vector<8x16xf32>
    %251 = vector.shape_cast %248 : vector<8x16xf32> to vector<1x8x16xf32>
    tpu.vector_store %arg5[%c6_75, %c0_76, %c0_77], %251 {strides = array<i32>} : memref<8x8x16xf32, #tpu.memory_space<vmem>>, vector<1x8x16xf32>,
    %c7 = arith.constant 7 : index
    %c0_78 = arith.constant 0 : index
    %c0_79 = arith.constant 0 : index
    %252 = vector.load %arg2[%c7, %c0_78, %c0_79] : memref<8x8x128xf32, #tpu.memory_space<vmem>>, vector<1x8x128xf32>
    %253 = vector.shape_cast %252 : vector<1x8x128xf32> to vector<8x128xf32>
    %254 = arith.truncf %248 : vector<8x16xf32> to vector<8x16xbf16>
    %cst_80 = arith.constant dense<0.000000e+00> : vector<8x128xf32>
    %255 = tpu.matmul %254, %3, %cst_80 {dimension_numbers = #tpu.dot_dimension_numbers<[1], [0], [0], [1], [0, 0, 1, 1], [], []>} : vector<8x16xbf16>, vector<16x128xbf16>, vector<8x128xf32> -> vector<8x128xf32>
    %256 = arith.addf %253, %255 : vector<8x128xf32>
    %257 = vector.extract_strided_slice %256 {offsets = [0, 0], sizes = [8, 32], strides = [1, 1]} : vector<8x128xf32> to vector<8x32xf32>
    %258 = arith.negf %257 : vector<8x32xf32>
    %259 = math.exp %258 : vector<8x32xf32>
    %cst_81 = arith.constant 1.000000e+00 : f32
    %260 = vector.broadcast %cst_81 : f32 to vector<8x32xf32>
    %261 = arith.addf %260, %259 : vector<8x32xf32>
    %262 = arith.divf %260, %261 : vector<8x32xf32>
    %263 = vector.extract_strided_slice %256 {offsets = [0, 32], sizes = [8, 32], strides = [1, 1]} : vector<8x128xf32> to vector<8x32xf32>
    %264 = arith.negf %263 : vector<8x32xf32>
    %265 = math.exp %264 : vector<8x32xf32>
    %cst_82 = arith.constant 1.000000e+00 : f32
    %266 = vector.broadcast %cst_82 : f32 to vector<8x32xf32>
    %267 = arith.addf %266, %265 : vector<8x32xf32>
    %268 = arith.divf %266, %267 : vector<8x32xf32>
    %269 = vector.extract_strided_slice %256 {offsets = [0, 64], sizes = [8, 32], strides = [1, 1]} : vector<8x128xf32> to vector<8x32xf32>
    %270 = math.tanh %269 : vector<8x32xf32>
    %271 = vector.extract_strided_slice %256 {offsets = [0, 96], sizes = [8, 32], strides = [1, 1]} : vector<8x128xf32> to vector<8x32xf32>
    %272 = arith.negf %271 : vector<8x32xf32>
    %273 = math.exp %272 : vector<8x32xf32>
    %cst_83 = arith.constant 1.000000e+00 : f32
    %274 = vector.broadcast %cst_83 : f32 to vector<8x32xf32>
    %275 = arith.addf %274, %273 : vector<8x32xf32>
    %276 = arith.divf %274, %275 : vector<8x32xf32>
    %277 = arith.mulf %268, %244 : vector<8x32xf32>
    %278 = arith.mulf %262, %270 : vector<8x32xf32>
    %279 = arith.addf %277, %278 : vector<8x32xf32>
    %280 = math.tanh %279 : vector<8x32xf32>
    %281 = arith.mulf %276, %280 : vector<8x32xf32>
    %282 = arith.truncf %281 : vector<8x32xf32> to vector<8x32xbf16>
    %cst_84 = arith.constant dense<0.000000e+00> : vector<8x16xf32>
    %283 = tpu.matmul %282, %4, %cst_84 {dimension_numbers = #tpu.dot_dimension_numbers<[1], [0], [0], [1], [0, 0, 1, 1], [], []>} : vector<8x32xbf16>, vector<32x16xbf16>, vector<8x16xf32> -> vector<8x16xf32>
    %c7_85 = arith.constant 7 : index
    %c0_86 = arith.constant 0 : index
    %c0_87 = arith.constant 0 : index
    %284 = vector.load %arg5[%c7_85, %c0_86, %c0_87] : memref<8x8x16xf32, #tpu.memory_space<vmem>>, vector<1x8x16xf32>
    %285 = vector.shape_cast %284 : vector<1x8x16xf32> to vector<8x16xf32>
    %286 = vector.shape_cast %283 : vector<8x16xf32> to vector<1x8x16xf32>
    tpu.vector_store %arg5[%c7_85, %c0_86, %c0_87], %286 {strides = array<i32>} : memref<8x8x16xf32, #tpu.memory_space<vmem>>, vector<1x8x16xf32>,
    %c0_88 = arith.constant 0 : index
    %c0_89 = arith.constant 0 : index
    %287 = vector.load %arg6[%c0_88, %c0_89] : memref<8x16xf32, #tpu.memory_space<vmem>>, vector<8x16xf32>
    tpu.vector_store %arg6[%c0_88, %c0_89], %283 {strides = array<i32>} : memref<8x16xf32, #tpu.memory_space<vmem>>, vector<8x16xf32>,
    %c0_90 = arith.constant 0 : index
    %c0_91 = arith.constant 0 : index
    %288 = vector.load %arg7[%c0_90, %c0_91] : memref<8x32xf32, #tpu.memory_space<vmem>>, vector<8x32xf32>
    tpu.vector_store %arg7[%c0_90, %c0_91], %279 {strides = array<i32>} : memref<8x32xf32, #tpu.memory_space<vmem>>, vector<8x32xf32>,
    return
  }
  func.func @transform_0(%arg0: i32, %arg1: i32) -> (i32, i32, i32) {
    %c0_i32 = arith.constant 0 : i32
    %c0_i32_0 = arith.constant 0 : i32
    return %arg1, %arg0, %c0_i32 : i32, i32, i32
  }
  func.func @transform_1(%arg0: i32, %arg1: i32) -> (i32, i32) {
    %c0_i32 = arith.constant 0 : i32
    %c0_i32_0 = arith.constant 0 : i32
    %c0_i32_1 = arith.constant 0 : i32
    return %c0_i32, %c0_i32_0 : i32, i32
  }
  func.func @transform_2(%arg0: i32, %arg1: i32) -> (i32, i32) {
    %c0_i32 = arith.constant 0 : i32
    %c0_i32_0 = arith.constant 0 : i32
    %c0_i32_1 = arith.constant 0 : i32
    return %c0_i32, %c0_i32_0 : i32, i32
  }
  func.func @transform_3(%arg0: i32, %arg1: i32) -> (i32, i32, i32) {
    %c0_i32 = arith.constant 0 : i32
    %c0_i32_0 = arith.constant 0 : i32
    return %arg1, %arg0, %c0_i32 : i32, i32, i32
  }
}

module attributes {stable_mosaic.version = 11 : i64} {
  func.func @lstm_block_kernel(%arg0: i32, %arg1: i32, %arg2: memref<8x8x128xf32, #tpu.memory_space<vmem>>, %arg3: memref<16x128xbf16, #tpu.memory_space<vmem>>, %arg4: memref<32x16xbf16, #tpu.memory_space<vmem>>, %arg5: memref<8x16xf32, #tpu.memory_space<vmem>>, %arg6: memref<8x16xf32, #tpu.memory_space<vmem>>, %arg7: memref<8x32xf32, #tpu.memory_space<vmem>>) attributes {dimension_semantics = [#tpu.dimension_semantics<parallel>, #tpu.dimension_semantics<arbitrary>], iteration_bounds = array<i64: 1, 1>, scalar_prefetch = 0 : i64, scratch_operands = 2 : i64, tpu.core_type = #tpu.core_type<tc>, window_params = [{transform_indices = @transform_0, window_bounds = array<i64: 8, 8, 128>}, {pipeline_mode = #tpu.pipeline_mode<synchronous>, transform_indices = @transform_1, window_bounds = array<i64: 16, 128>}, {pipeline_mode = #tpu.pipeline_mode<synchronous>, transform_indices = @transform_2, window_bounds = array<i64: 32, 16>}, {transform_indices = @transform_3, window_bounds = array<i64: 8, 16>}]} {
    %c0_i32 = arith.constant 0 : i32
    %0 = arith.cmpi eq, %arg1, %c0_i32 : i32
    %1 = arith.extui %0 : i1 to i32
    %c0_i32_0 = arith.constant 0 : i32
    %2 = arith.cmpi ne, %1, %c0_i32_0 : i32
    scf.if %2 {
      %cst_70 = arith.constant 0.000000e+00 : f32
      %266 = vector.broadcast %cst_70 : f32 to vector<8x16xf32>
      %c0_71 = arith.constant 0 : index
      %c0_72 = arith.constant 0 : index
      %267 = vector.load %arg6[%c0_71, %c0_72] : memref<8x16xf32, #tpu.memory_space<vmem>>, vector<8x16xf32>
      tpu.vector_store %arg6[%c0_71, %c0_72], %266 {strides = array<i32>} : memref<8x16xf32, #tpu.memory_space<vmem>>, vector<8x16xf32>,
      %cst_73 = arith.constant 0.000000e+00 : f32
      %268 = vector.broadcast %cst_73 : f32 to vector<8x32xf32>
      %c0_74 = arith.constant 0 : index
      %c0_75 = arith.constant 0 : index
      %269 = vector.load %arg7[%c0_74, %c0_75] : memref<8x32xf32, #tpu.memory_space<vmem>>, vector<8x32xf32>
      tpu.vector_store %arg7[%c0_74, %c0_75], %268 {strides = array<i32>} : memref<8x32xf32, #tpu.memory_space<vmem>>, vector<8x32xf32>,
    } else {
    }
    %c0 = arith.constant 0 : index
    %c0_1 = arith.constant 0 : index
    %3 = vector.load %arg3[%c0, %c0_1] : memref<16x128xbf16, #tpu.memory_space<vmem>>, vector<16x128xbf16>
    %c0_2 = arith.constant 0 : index
    %c0_3 = arith.constant 0 : index
    %4 = vector.load %arg4[%c0_2, %c0_3] : memref<32x16xbf16, #tpu.memory_space<vmem>>, vector<32x16xbf16>
    %c0_4 = arith.constant 0 : index
    %c0_5 = arith.constant 0 : index
    %5 = vector.load %arg6[%c0_4, %c0_5] : memref<8x16xf32, #tpu.memory_space<vmem>>, vector<8x16xf32>
    %c0_6 = arith.constant 0 : index
    %c0_7 = arith.constant 0 : index
    %6 = vector.load %arg7[%c0_6, %c0_7] : memref<8x32xf32, #tpu.memory_space<vmem>>, vector<8x32xf32>
    %c0_8 = arith.constant 0 : index
    %c0_9 = arith.constant 0 : index
    %c0_10 = arith.constant 0 : index
    %7 = vector.load %arg2[%c0_8, %c0_9, %c0_10] : memref<8x8x128xf32, #tpu.memory_space<vmem>>, vector<1x8x128xf32>
    %8 = vector.shape_cast %7 : vector<1x8x128xf32> to vector<8x128xf32>
    %9 = arith.truncf %5 : vector<8x16xf32> to vector<8x16xbf16>
    %cst = arith.constant dense<0.000000e+00> : vector<8x128xf32>
    %10 = tpu.matmul %9, %3, %cst {dimension_numbers = #tpu.dot_dimension_numbers<[1], [0], [0], [1], [0, 0, 1, 1], [], []>} : vector<8x16xbf16>, vector<16x128xbf16>, vector<8x128xf32> -> vector<8x128xf32>
    %11 = arith.addf %8, %10 : vector<8x128xf32>
    %12 = vector.extract_strided_slice %11 {offsets = [0, 0], sizes = [8, 32], strides = [1, 1]} : vector<8x128xf32> to vector<8x32xf32>
    %13 = arith.negf %12 : vector<8x32xf32>
    %14 = math.exp %13 : vector<8x32xf32>
    %cst_11 = arith.constant 1.000000e+00 : f32
    %15 = vector.broadcast %cst_11 : f32 to vector<8x32xf32>
    %16 = arith.addf %15, %14 : vector<8x32xf32>
    %17 = arith.divf %15, %16 : vector<8x32xf32>
    %18 = vector.extract_strided_slice %11 {offsets = [0, 32], sizes = [8, 32], strides = [1, 1]} : vector<8x128xf32> to vector<8x32xf32>
    %19 = arith.negf %18 : vector<8x32xf32>
    %20 = math.exp %19 : vector<8x32xf32>
    %cst_12 = arith.constant 1.000000e+00 : f32
    %21 = vector.broadcast %cst_12 : f32 to vector<8x32xf32>
    %22 = arith.addf %21, %20 : vector<8x32xf32>
    %23 = arith.divf %21, %22 : vector<8x32xf32>
    %24 = vector.extract_strided_slice %11 {offsets = [0, 64], sizes = [8, 32], strides = [1, 1]} : vector<8x128xf32> to vector<8x32xf32>
    %25 = math.tanh %24 : vector<8x32xf32>
    %26 = vector.extract_strided_slice %11 {offsets = [0, 96], sizes = [8, 32], strides = [1, 1]} : vector<8x128xf32> to vector<8x32xf32>
    %27 = arith.negf %26 : vector<8x32xf32>
    %28 = math.exp %27 : vector<8x32xf32>
    %cst_13 = arith.constant 1.000000e+00 : f32
    %29 = vector.broadcast %cst_13 : f32 to vector<8x32xf32>
    %30 = arith.addf %29, %28 : vector<8x32xf32>
    %31 = arith.divf %29, %30 : vector<8x32xf32>
    %32 = arith.mulf %23, %6 : vector<8x32xf32>
    %33 = arith.mulf %17, %25 : vector<8x32xf32>
    %34 = arith.addf %32, %33 : vector<8x32xf32>
    %35 = math.tanh %34 : vector<8x32xf32>
    %36 = arith.mulf %31, %35 : vector<8x32xf32>
    %37 = arith.truncf %36 : vector<8x32xf32> to vector<8x32xbf16>
    %cst_14 = arith.constant dense<0.000000e+00> : vector<8x16xf32>
    %38 = tpu.matmul %37, %4, %cst_14 {dimension_numbers = #tpu.dot_dimension_numbers<[1], [0], [0], [1], [0, 0, 1, 1], [], []>} : vector<8x32xbf16>, vector<32x16xbf16>, vector<8x16xf32> -> vector<8x16xf32>
    %c1 = arith.constant 1 : index
    %c0_15 = arith.constant 0 : index
    %c0_16 = arith.constant 0 : index
    %39 = vector.load %arg2[%c1, %c0_15, %c0_16] : memref<8x8x128xf32, #tpu.memory_space<vmem>>, vector<1x8x128xf32>
    %40 = vector.shape_cast %39 : vector<1x8x128xf32> to vector<8x128xf32>
    %41 = arith.truncf %38 : vector<8x16xf32> to vector<8x16xbf16>
    %cst_17 = arith.constant dense<0.000000e+00> : vector<8x128xf32>
    %42 = tpu.matmul %41, %3, %cst_17 {dimension_numbers = #tpu.dot_dimension_numbers<[1], [0], [0], [1], [0, 0, 1, 1], [], []>} : vector<8x16xbf16>, vector<16x128xbf16>, vector<8x128xf32> -> vector<8x128xf32>
    %43 = arith.addf %40, %42 : vector<8x128xf32>
    %44 = vector.extract_strided_slice %43 {offsets = [0, 0], sizes = [8, 32], strides = [1, 1]} : vector<8x128xf32> to vector<8x32xf32>
    %45 = arith.negf %44 : vector<8x32xf32>
    %46 = math.exp %45 : vector<8x32xf32>
    %cst_18 = arith.constant 1.000000e+00 : f32
    %47 = vector.broadcast %cst_18 : f32 to vector<8x32xf32>
    %48 = arith.addf %47, %46 : vector<8x32xf32>
    %49 = arith.divf %47, %48 : vector<8x32xf32>
    %50 = vector.extract_strided_slice %43 {offsets = [0, 32], sizes = [8, 32], strides = [1, 1]} : vector<8x128xf32> to vector<8x32xf32>
    %51 = arith.negf %50 : vector<8x32xf32>
    %52 = math.exp %51 : vector<8x32xf32>
    %cst_19 = arith.constant 1.000000e+00 : f32
    %53 = vector.broadcast %cst_19 : f32 to vector<8x32xf32>
    %54 = arith.addf %53, %52 : vector<8x32xf32>
    %55 = arith.divf %53, %54 : vector<8x32xf32>
    %56 = vector.extract_strided_slice %43 {offsets = [0, 64], sizes = [8, 32], strides = [1, 1]} : vector<8x128xf32> to vector<8x32xf32>
    %57 = math.tanh %56 : vector<8x32xf32>
    %58 = vector.extract_strided_slice %43 {offsets = [0, 96], sizes = [8, 32], strides = [1, 1]} : vector<8x128xf32> to vector<8x32xf32>
    %59 = arith.negf %58 : vector<8x32xf32>
    %60 = math.exp %59 : vector<8x32xf32>
    %cst_20 = arith.constant 1.000000e+00 : f32
    %61 = vector.broadcast %cst_20 : f32 to vector<8x32xf32>
    %62 = arith.addf %61, %60 : vector<8x32xf32>
    %63 = arith.divf %61, %62 : vector<8x32xf32>
    %64 = arith.mulf %55, %34 : vector<8x32xf32>
    %65 = arith.mulf %49, %57 : vector<8x32xf32>
    %66 = arith.addf %64, %65 : vector<8x32xf32>
    %67 = math.tanh %66 : vector<8x32xf32>
    %68 = arith.mulf %63, %67 : vector<8x32xf32>
    %69 = arith.truncf %68 : vector<8x32xf32> to vector<8x32xbf16>
    %cst_21 = arith.constant dense<0.000000e+00> : vector<8x16xf32>
    %70 = tpu.matmul %69, %4, %cst_21 {dimension_numbers = #tpu.dot_dimension_numbers<[1], [0], [0], [1], [0, 0, 1, 1], [], []>} : vector<8x32xbf16>, vector<32x16xbf16>, vector<8x16xf32> -> vector<8x16xf32>
    %c2 = arith.constant 2 : index
    %c0_22 = arith.constant 0 : index
    %c0_23 = arith.constant 0 : index
    %71 = vector.load %arg2[%c2, %c0_22, %c0_23] : memref<8x8x128xf32, #tpu.memory_space<vmem>>, vector<1x8x128xf32>
    %72 = vector.shape_cast %71 : vector<1x8x128xf32> to vector<8x128xf32>
    %73 = arith.truncf %70 : vector<8x16xf32> to vector<8x16xbf16>
    %cst_24 = arith.constant dense<0.000000e+00> : vector<8x128xf32>
    %74 = tpu.matmul %73, %3, %cst_24 {dimension_numbers = #tpu.dot_dimension_numbers<[1], [0], [0], [1], [0, 0, 1, 1], [], []>} : vector<8x16xbf16>, vector<16x128xbf16>, vector<8x128xf32> -> vector<8x128xf32>
    %75 = arith.addf %72, %74 : vector<8x128xf32>
    %76 = vector.extract_strided_slice %75 {offsets = [0, 0], sizes = [8, 32], strides = [1, 1]} : vector<8x128xf32> to vector<8x32xf32>
    %77 = arith.negf %76 : vector<8x32xf32>
    %78 = math.exp %77 : vector<8x32xf32>
    %cst_25 = arith.constant 1.000000e+00 : f32
    %79 = vector.broadcast %cst_25 : f32 to vector<8x32xf32>
    %80 = arith.addf %79, %78 : vector<8x32xf32>
    %81 = arith.divf %79, %80 : vector<8x32xf32>
    %82 = vector.extract_strided_slice %75 {offsets = [0, 32], sizes = [8, 32], strides = [1, 1]} : vector<8x128xf32> to vector<8x32xf32>
    %83 = arith.negf %82 : vector<8x32xf32>
    %84 = math.exp %83 : vector<8x32xf32>
    %cst_26 = arith.constant 1.000000e+00 : f32
    %85 = vector.broadcast %cst_26 : f32 to vector<8x32xf32>
    %86 = arith.addf %85, %84 : vector<8x32xf32>
    %87 = arith.divf %85, %86 : vector<8x32xf32>
    %88 = vector.extract_strided_slice %75 {offsets = [0, 64], sizes = [8, 32], strides = [1, 1]} : vector<8x128xf32> to vector<8x32xf32>
    %89 = math.tanh %88 : vector<8x32xf32>
    %90 = vector.extract_strided_slice %75 {offsets = [0, 96], sizes = [8, 32], strides = [1, 1]} : vector<8x128xf32> to vector<8x32xf32>
    %91 = arith.negf %90 : vector<8x32xf32>
    %92 = math.exp %91 : vector<8x32xf32>
    %cst_27 = arith.constant 1.000000e+00 : f32
    %93 = vector.broadcast %cst_27 : f32 to vector<8x32xf32>
    %94 = arith.addf %93, %92 : vector<8x32xf32>
    %95 = arith.divf %93, %94 : vector<8x32xf32>
    %96 = arith.mulf %87, %66 : vector<8x32xf32>
    %97 = arith.mulf %81, %89 : vector<8x32xf32>
    %98 = arith.addf %96, %97 : vector<8x32xf32>
    %99 = math.tanh %98 : vector<8x32xf32>
    %100 = arith.mulf %95, %99 : vector<8x32xf32>
    %101 = arith.truncf %100 : vector<8x32xf32> to vector<8x32xbf16>
    %cst_28 = arith.constant dense<0.000000e+00> : vector<8x16xf32>
    %102 = tpu.matmul %101, %4, %cst_28 {dimension_numbers = #tpu.dot_dimension_numbers<[1], [0], [0], [1], [0, 0, 1, 1], [], []>} : vector<8x32xbf16>, vector<32x16xbf16>, vector<8x16xf32> -> vector<8x16xf32>
    %c3 = arith.constant 3 : index
    %c0_29 = arith.constant 0 : index
    %c0_30 = arith.constant 0 : index
    %103 = vector.load %arg2[%c3, %c0_29, %c0_30] : memref<8x8x128xf32, #tpu.memory_space<vmem>>, vector<1x8x128xf32>
    %104 = vector.shape_cast %103 : vector<1x8x128xf32> to vector<8x128xf32>
    %105 = arith.truncf %102 : vector<8x16xf32> to vector<8x16xbf16>
    %cst_31 = arith.constant dense<0.000000e+00> : vector<8x128xf32>
    %106 = tpu.matmul %105, %3, %cst_31 {dimension_numbers = #tpu.dot_dimension_numbers<[1], [0], [0], [1], [0, 0, 1, 1], [], []>} : vector<8x16xbf16>, vector<16x128xbf16>, vector<8x128xf32> -> vector<8x128xf32>
    %107 = arith.addf %104, %106 : vector<8x128xf32>
    %108 = vector.extract_strided_slice %107 {offsets = [0, 0], sizes = [8, 32], strides = [1, 1]} : vector<8x128xf32> to vector<8x32xf32>
    %109 = arith.negf %108 : vector<8x32xf32>
    %110 = math.exp %109 : vector<8x32xf32>
    %cst_32 = arith.constant 1.000000e+00 : f32
    %111 = vector.broadcast %cst_32 : f32 to vector<8x32xf32>
    %112 = arith.addf %111, %110 : vector<8x32xf32>
    %113 = arith.divf %111, %112 : vector<8x32xf32>
    %114 = vector.extract_strided_slice %107 {offsets = [0, 32], sizes = [8, 32], strides = [1, 1]} : vector<8x128xf32> to vector<8x32xf32>
    %115 = arith.negf %114 : vector<8x32xf32>
    %116 = math.exp %115 : vector<8x32xf32>
    %cst_33 = arith.constant 1.000000e+00 : f32
    %117 = vector.broadcast %cst_33 : f32 to vector<8x32xf32>
    %118 = arith.addf %117, %116 : vector<8x32xf32>
    %119 = arith.divf %117, %118 : vector<8x32xf32>
    %120 = vector.extract_strided_slice %107 {offsets = [0, 64], sizes = [8, 32], strides = [1, 1]} : vector<8x128xf32> to vector<8x32xf32>
    %121 = math.tanh %120 : vector<8x32xf32>
    %122 = vector.extract_strided_slice %107 {offsets = [0, 96], sizes = [8, 32], strides = [1, 1]} : vector<8x128xf32> to vector<8x32xf32>
    %123 = arith.negf %122 : vector<8x32xf32>
    %124 = math.exp %123 : vector<8x32xf32>
    %cst_34 = arith.constant 1.000000e+00 : f32
    %125 = vector.broadcast %cst_34 : f32 to vector<8x32xf32>
    %126 = arith.addf %125, %124 : vector<8x32xf32>
    %127 = arith.divf %125, %126 : vector<8x32xf32>
    %128 = arith.mulf %119, %98 : vector<8x32xf32>
    %129 = arith.mulf %113, %121 : vector<8x32xf32>
    %130 = arith.addf %128, %129 : vector<8x32xf32>
    %131 = math.tanh %130 : vector<8x32xf32>
    %132 = arith.mulf %127, %131 : vector<8x32xf32>
    %133 = arith.truncf %132 : vector<8x32xf32> to vector<8x32xbf16>
    %cst_35 = arith.constant dense<0.000000e+00> : vector<8x16xf32>
    %134 = tpu.matmul %133, %4, %cst_35 {dimension_numbers = #tpu.dot_dimension_numbers<[1], [0], [0], [1], [0, 0, 1, 1], [], []>} : vector<8x32xbf16>, vector<32x16xbf16>, vector<8x16xf32> -> vector<8x16xf32>
    %c4 = arith.constant 4 : index
    %c0_36 = arith.constant 0 : index
    %c0_37 = arith.constant 0 : index
    %135 = vector.load %arg2[%c4, %c0_36, %c0_37] : memref<8x8x128xf32, #tpu.memory_space<vmem>>, vector<1x8x128xf32>
    %136 = vector.shape_cast %135 : vector<1x8x128xf32> to vector<8x128xf32>
    %137 = arith.truncf %134 : vector<8x16xf32> to vector<8x16xbf16>
    %cst_38 = arith.constant dense<0.000000e+00> : vector<8x128xf32>
    %138 = tpu.matmul %137, %3, %cst_38 {dimension_numbers = #tpu.dot_dimension_numbers<[1], [0], [0], [1], [0, 0, 1, 1], [], []>} : vector<8x16xbf16>, vector<16x128xbf16>, vector<8x128xf32> -> vector<8x128xf32>
    %139 = arith.addf %136, %138 : vector<8x128xf32>
    %140 = vector.extract_strided_slice %139 {offsets = [0, 0], sizes = [8, 32], strides = [1, 1]} : vector<8x128xf32> to vector<8x32xf32>
    %141 = arith.negf %140 : vector<8x32xf32>
    %142 = math.exp %141 : vector<8x32xf32>
    %cst_39 = arith.constant 1.000000e+00 : f32
    %143 = vector.broadcast %cst_39 : f32 to vector<8x32xf32>
    %144 = arith.addf %143, %142 : vector<8x32xf32>
    %145 = arith.divf %143, %144 : vector<8x32xf32>
    %146 = vector.extract_strided_slice %139 {offsets = [0, 32], sizes = [8, 32], strides = [1, 1]} : vector<8x128xf32> to vector<8x32xf32>
    %147 = arith.negf %146 : vector<8x32xf32>
    %148 = math.exp %147 : vector<8x32xf32>
    %cst_40 = arith.constant 1.000000e+00 : f32
    %149 = vector.broadcast %cst_40 : f32 to vector<8x32xf32>
    %150 = arith.addf %149, %148 : vector<8x32xf32>
    %151 = arith.divf %149, %150 : vector<8x32xf32>
    %152 = vector.extract_strided_slice %139 {offsets = [0, 64], sizes = [8, 32], strides = [1, 1]} : vector<8x128xf32> to vector<8x32xf32>
    %153 = math.tanh %152 : vector<8x32xf32>
    %154 = vector.extract_strided_slice %139 {offsets = [0, 96], sizes = [8, 32], strides = [1, 1]} : vector<8x128xf32> to vector<8x32xf32>
    %155 = arith.negf %154 : vector<8x32xf32>
    %156 = math.exp %155 : vector<8x32xf32>
    %cst_41 = arith.constant 1.000000e+00 : f32
    %157 = vector.broadcast %cst_41 : f32 to vector<8x32xf32>
    %158 = arith.addf %157, %156 : vector<8x32xf32>
    %159 = arith.divf %157, %158 : vector<8x32xf32>
    %160 = arith.mulf %151, %130 : vector<8x32xf32>
    %161 = arith.mulf %145, %153 : vector<8x32xf32>
    %162 = arith.addf %160, %161 : vector<8x32xf32>
    %163 = math.tanh %162 : vector<8x32xf32>
    %164 = arith.mulf %159, %163 : vector<8x32xf32>
    %165 = arith.truncf %164 : vector<8x32xf32> to vector<8x32xbf16>
    %cst_42 = arith.constant dense<0.000000e+00> : vector<8x16xf32>
    %166 = tpu.matmul %165, %4, %cst_42 {dimension_numbers = #tpu.dot_dimension_numbers<[1], [0], [0], [1], [0, 0, 1, 1], [], []>} : vector<8x32xbf16>, vector<32x16xbf16>, vector<8x16xf32> -> vector<8x16xf32>
    %c5 = arith.constant 5 : index
    %c0_43 = arith.constant 0 : index
    %c0_44 = arith.constant 0 : index
    %167 = vector.load %arg2[%c5, %c0_43, %c0_44] : memref<8x8x128xf32, #tpu.memory_space<vmem>>, vector<1x8x128xf32>
    %168 = vector.shape_cast %167 : vector<1x8x128xf32> to vector<8x128xf32>
    %169 = arith.truncf %166 : vector<8x16xf32> to vector<8x16xbf16>
    %cst_45 = arith.constant dense<0.000000e+00> : vector<8x128xf32>
    %170 = tpu.matmul %169, %3, %cst_45 {dimension_numbers = #tpu.dot_dimension_numbers<[1], [0], [0], [1], [0, 0, 1, 1], [], []>} : vector<8x16xbf16>, vector<16x128xbf16>, vector<8x128xf32> -> vector<8x128xf32>
    %171 = arith.addf %168, %170 : vector<8x128xf32>
    %172 = vector.extract_strided_slice %171 {offsets = [0, 0], sizes = [8, 32], strides = [1, 1]} : vector<8x128xf32> to vector<8x32xf32>
    %173 = arith.negf %172 : vector<8x32xf32>
    %174 = math.exp %173 : vector<8x32xf32>
    %cst_46 = arith.constant 1.000000e+00 : f32
    %175 = vector.broadcast %cst_46 : f32 to vector<8x32xf32>
    %176 = arith.addf %175, %174 : vector<8x32xf32>
    %177 = arith.divf %175, %176 : vector<8x32xf32>
    %178 = vector.extract_strided_slice %171 {offsets = [0, 32], sizes = [8, 32], strides = [1, 1]} : vector<8x128xf32> to vector<8x32xf32>
    %179 = arith.negf %178 : vector<8x32xf32>
    %180 = math.exp %179 : vector<8x32xf32>
    %cst_47 = arith.constant 1.000000e+00 : f32
    %181 = vector.broadcast %cst_47 : f32 to vector<8x32xf32>
    %182 = arith.addf %181, %180 : vector<8x32xf32>
    %183 = arith.divf %181, %182 : vector<8x32xf32>
    %184 = vector.extract_strided_slice %171 {offsets = [0, 64], sizes = [8, 32], strides = [1, 1]} : vector<8x128xf32> to vector<8x32xf32>
    %185 = math.tanh %184 : vector<8x32xf32>
    %186 = vector.extract_strided_slice %171 {offsets = [0, 96], sizes = [8, 32], strides = [1, 1]} : vector<8x128xf32> to vector<8x32xf32>
    %187 = arith.negf %186 : vector<8x32xf32>
    %188 = math.exp %187 : vector<8x32xf32>
    %cst_48 = arith.constant 1.000000e+00 : f32
    %189 = vector.broadcast %cst_48 : f32 to vector<8x32xf32>
    %190 = arith.addf %189, %188 : vector<8x32xf32>
    %191 = arith.divf %189, %190 : vector<8x32xf32>
    %192 = arith.mulf %183, %162 : vector<8x32xf32>
    %193 = arith.mulf %177, %185 : vector<8x32xf32>
    %194 = arith.addf %192, %193 : vector<8x32xf32>
    %195 = math.tanh %194 : vector<8x32xf32>
    %196 = arith.mulf %191, %195 : vector<8x32xf32>
    %197 = arith.truncf %196 : vector<8x32xf32> to vector<8x32xbf16>
    %cst_49 = arith.constant dense<0.000000e+00> : vector<8x16xf32>
    %198 = tpu.matmul %197, %4, %cst_49 {dimension_numbers = #tpu.dot_dimension_numbers<[1], [0], [0], [1], [0, 0, 1, 1], [], []>} : vector<8x32xbf16>, vector<32x16xbf16>, vector<8x16xf32> -> vector<8x16xf32>
    %c6 = arith.constant 6 : index
    %c0_50 = arith.constant 0 : index
    %c0_51 = arith.constant 0 : index
    %199 = vector.load %arg2[%c6, %c0_50, %c0_51] : memref<8x8x128xf32, #tpu.memory_space<vmem>>, vector<1x8x128xf32>
    %200 = vector.shape_cast %199 : vector<1x8x128xf32> to vector<8x128xf32>
    %201 = arith.truncf %198 : vector<8x16xf32> to vector<8x16xbf16>
    %cst_52 = arith.constant dense<0.000000e+00> : vector<8x128xf32>
    %202 = tpu.matmul %201, %3, %cst_52 {dimension_numbers = #tpu.dot_dimension_numbers<[1], [0], [0], [1], [0, 0, 1, 1], [], []>} : vector<8x16xbf16>, vector<16x128xbf16>, vector<8x128xf32> -> vector<8x128xf32>
    %203 = arith.addf %200, %202 : vector<8x128xf32>
    %204 = vector.extract_strided_slice %203 {offsets = [0, 0], sizes = [8, 32], strides = [1, 1]} : vector<8x128xf32> to vector<8x32xf32>
    %205 = arith.negf %204 : vector<8x32xf32>
    %206 = math.exp %205 : vector<8x32xf32>
    %cst_53 = arith.constant 1.000000e+00 : f32
    %207 = vector.broadcast %cst_53 : f32 to vector<8x32xf32>
    %208 = arith.addf %207, %206 : vector<8x32xf32>
    %209 = arith.divf %207, %208 : vector<8x32xf32>
    %210 = vector.extract_strided_slice %203 {offsets = [0, 32], sizes = [8, 32], strides = [1, 1]} : vector<8x128xf32> to vector<8x32xf32>
    %211 = arith.negf %210 : vector<8x32xf32>
    %212 = math.exp %211 : vector<8x32xf32>
    %cst_54 = arith.constant 1.000000e+00 : f32
    %213 = vector.broadcast %cst_54 : f32 to vector<8x32xf32>
    %214 = arith.addf %213, %212 : vector<8x32xf32>
    %215 = arith.divf %213, %214 : vector<8x32xf32>
    %216 = vector.extract_strided_slice %203 {offsets = [0, 64], sizes = [8, 32], strides = [1, 1]} : vector<8x128xf32> to vector<8x32xf32>
    %217 = math.tanh %216 : vector<8x32xf32>
    %218 = vector.extract_strided_slice %203 {offsets = [0, 96], sizes = [8, 32], strides = [1, 1]} : vector<8x128xf32> to vector<8x32xf32>
    %219 = arith.negf %218 : vector<8x32xf32>
    %220 = math.exp %219 : vector<8x32xf32>
    %cst_55 = arith.constant 1.000000e+00 : f32
    %221 = vector.broadcast %cst_55 : f32 to vector<8x32xf32>
    %222 = arith.addf %221, %220 : vector<8x32xf32>
    %223 = arith.divf %221, %222 : vector<8x32xf32>
    %224 = arith.mulf %215, %194 : vector<8x32xf32>
    %225 = arith.mulf %209, %217 : vector<8x32xf32>
    %226 = arith.addf %224, %225 : vector<8x32xf32>
    %227 = math.tanh %226 : vector<8x32xf32>
    %228 = arith.mulf %223, %227 : vector<8x32xf32>
    %229 = arith.truncf %228 : vector<8x32xf32> to vector<8x32xbf16>
    %cst_56 = arith.constant dense<0.000000e+00> : vector<8x16xf32>
    %230 = tpu.matmul %229, %4, %cst_56 {dimension_numbers = #tpu.dot_dimension_numbers<[1], [0], [0], [1], [0, 0, 1, 1], [], []>} : vector<8x32xbf16>, vector<32x16xbf16>, vector<8x16xf32> -> vector<8x16xf32>
    %c7 = arith.constant 7 : index
    %c0_57 = arith.constant 0 : index
    %c0_58 = arith.constant 0 : index
    %231 = vector.load %arg2[%c7, %c0_57, %c0_58] : memref<8x8x128xf32, #tpu.memory_space<vmem>>, vector<1x8x128xf32>
    %232 = vector.shape_cast %231 : vector<1x8x128xf32> to vector<8x128xf32>
    %233 = arith.truncf %230 : vector<8x16xf32> to vector<8x16xbf16>
    %cst_59 = arith.constant dense<0.000000e+00> : vector<8x128xf32>
    %234 = tpu.matmul %233, %3, %cst_59 {dimension_numbers = #tpu.dot_dimension_numbers<[1], [0], [0], [1], [0, 0, 1, 1], [], []>} : vector<8x16xbf16>, vector<16x128xbf16>, vector<8x128xf32> -> vector<8x128xf32>
    %235 = arith.addf %232, %234 : vector<8x128xf32>
    %236 = vector.extract_strided_slice %235 {offsets = [0, 0], sizes = [8, 32], strides = [1, 1]} : vector<8x128xf32> to vector<8x32xf32>
    %237 = arith.negf %236 : vector<8x32xf32>
    %238 = math.exp %237 : vector<8x32xf32>
    %cst_60 = arith.constant 1.000000e+00 : f32
    %239 = vector.broadcast %cst_60 : f32 to vector<8x32xf32>
    %240 = arith.addf %239, %238 : vector<8x32xf32>
    %241 = arith.divf %239, %240 : vector<8x32xf32>
    %242 = vector.extract_strided_slice %235 {offsets = [0, 32], sizes = [8, 32], strides = [1, 1]} : vector<8x128xf32> to vector<8x32xf32>
    %243 = arith.negf %242 : vector<8x32xf32>
    %244 = math.exp %243 : vector<8x32xf32>
    %cst_61 = arith.constant 1.000000e+00 : f32
    %245 = vector.broadcast %cst_61 : f32 to vector<8x32xf32>
    %246 = arith.addf %245, %244 : vector<8x32xf32>
    %247 = arith.divf %245, %246 : vector<8x32xf32>
    %248 = vector.extract_strided_slice %235 {offsets = [0, 64], sizes = [8, 32], strides = [1, 1]} : vector<8x128xf32> to vector<8x32xf32>
    %249 = math.tanh %248 : vector<8x32xf32>
    %250 = vector.extract_strided_slice %235 {offsets = [0, 96], sizes = [8, 32], strides = [1, 1]} : vector<8x128xf32> to vector<8x32xf32>
    %251 = arith.negf %250 : vector<8x32xf32>
    %252 = math.exp %251 : vector<8x32xf32>
    %cst_62 = arith.constant 1.000000e+00 : f32
    %253 = vector.broadcast %cst_62 : f32 to vector<8x32xf32>
    %254 = arith.addf %253, %252 : vector<8x32xf32>
    %255 = arith.divf %253, %254 : vector<8x32xf32>
    %256 = arith.mulf %247, %226 : vector<8x32xf32>
    %257 = arith.mulf %241, %249 : vector<8x32xf32>
    %258 = arith.addf %256, %257 : vector<8x32xf32>
    %259 = math.tanh %258 : vector<8x32xf32>
    %260 = arith.mulf %255, %259 : vector<8x32xf32>
    %261 = arith.truncf %260 : vector<8x32xf32> to vector<8x32xbf16>
    %cst_63 = arith.constant dense<0.000000e+00> : vector<8x16xf32>
    %262 = tpu.matmul %261, %4, %cst_63 {dimension_numbers = #tpu.dot_dimension_numbers<[1], [0], [0], [1], [0, 0, 1, 1], [], []>} : vector<8x32xbf16>, vector<32x16xbf16>, vector<8x16xf32> -> vector<8x16xf32>
    %c0_64 = arith.constant 0 : index
    %c0_65 = arith.constant 0 : index
    %263 = vector.load %arg6[%c0_64, %c0_65] : memref<8x16xf32, #tpu.memory_space<vmem>>, vector<8x16xf32>
    tpu.vector_store %arg6[%c0_64, %c0_65], %262 {strides = array<i32>} : memref<8x16xf32, #tpu.memory_space<vmem>>, vector<8x16xf32>,
    %c0_66 = arith.constant 0 : index
    %c0_67 = arith.constant 0 : index
    %264 = vector.load %arg7[%c0_66, %c0_67] : memref<8x32xf32, #tpu.memory_space<vmem>>, vector<8x32xf32>
    tpu.vector_store %arg7[%c0_66, %c0_67], %258 {strides = array<i32>} : memref<8x32xf32, #tpu.memory_space<vmem>>, vector<8x32xf32>,
    %c0_68 = arith.constant 0 : index
    %c0_69 = arith.constant 0 : index
    %265 = vector.load %arg5[%c0_68, %c0_69] : memref<8x16xf32, #tpu.memory_space<vmem>>, vector<8x16xf32>
    tpu.vector_store %arg5[%c0_68, %c0_69], %262 {strides = array<i32>} : memref<8x16xf32, #tpu.memory_space<vmem>>, vector<8x16xf32>,
    return
  }
  func.func @transform_0(%arg0: i32, %arg1: i32) -> (i32, i32, i32) {
    %c0_i32 = arith.constant 0 : i32
    %c0_i32_0 = arith.constant 0 : i32
    return %arg1, %arg0, %c0_i32 : i32, i32, i32
  }
  func.func @transform_1(%arg0: i32, %arg1: i32) -> (i32, i32) {
    %c0_i32 = arith.constant 0 : i32
    %c0_i32_0 = arith.constant 0 : i32
    %c0_i32_1 = arith.constant 0 : i32
    return %c0_i32, %c0_i32_0 : i32, i32
  }
  func.func @transform_2(%arg0: i32, %arg1: i32) -> (i32, i32) {
    %c0_i32 = arith.constant 0 : i32
    %c0_i32_0 = arith.constant 0 : i32
    %c0_i32_1 = arith.constant 0 : i32
    return %c0_i32, %c0_i32_0 : i32, i32
  }
  func.func @transform_3(%arg0: i32, %arg1: i32) -> (i32, i32) {
    %c0_i32 = arith.constant 0 : i32
    %c0_i32_0 = arith.constant 0 : i32
    return %arg0, %c0_i32 : i32, i32
  }
}

</mosaic_0001>

<bundles_post_ra>
// kernel: forward.5
= control target key start
LH: loop header
LB: loop body
LE: loop exit
PB: predicated region body
PF: predicated region fallthrough
CT: control target
= control target key end

     0   :  { %vm58_vm0 = vcmask 130048   ;;  %s242_s1 = inlined_call_operand.vmem [shape: bf16[16,128], index: 1, kind: input, shape index: {}]   ;;  %s243_s0 = inlined_call_operand.vmem [shape: bf16[64,16], index: 0, kind: input, shape index: {}]   ;;  %s244_s2 = inlined_call_operand.vmem [shape: f32[1,128], index: 2, kind: input, shape index: {}]   ;;  %s245_s3 = inlined_call_operand.vmem [shape: f32[64,128], index: 3, kind: output, shape index: {}]  }
   0x1   :  { %v175_v0 = vld [vmem:[%s242_s1] sm:$0xff]   ;;  %v177_v2 = vld [vmem:[%s243_s0 + $0x10] sm:$0xff]   ;;  %v178_v3 = vld [vmem:[%s243_s0 + $0x8] sm:$0xff]  }
   0x2   :  { %v176_v1 = vld [vmem:[%s243_s0] sm:$0xff]   ;;  %163 = vmatprep.subr.bf16.mxu0 %v175_v0  ;;  %173 = vmatprep.subr.bf16.mxu1 %v175_v0  ;;  %v179_v4 = vld [vmem:[%s243_s0 + $0x18] sm:$0xff]  }
   0x3   :  { %164 = vmatpush3.bf16.msra.mxu0 %v175_v0  ;;  %174 = vmatpush3.bf16.msra.mxu1 %v175_v0  ;;  %v148_v5 = vld [vmem:[%s244_s2] ss:$0 sm:$0xff] }
   0x4   :  { %165 = vmatprep.mubr.msk.bf16.mxu0 %vm58_vm0, %v176_v1  ;;  %169 = vmatprep.mubr.msk.bf16.mxu1 %vm58_vm0, %v177_v2 }
   0x6   :  { %166 = vmatmul.mubr.msk.bf16.vlgmr.msra.gmra.mrb[0].mxu0 %vm58_vm0, %v178_v3  ;;  %170 = vmatmul.mubr.msk.bf16.vlgmr.msra.gmra.mrb[0].mxu1 %vm58_vm0, %v179_v4 }
  0xd9   :  { %v167_v6 = vpop.f32.mrb[0].mxu0  ;;  %v171_v7 = vpop.f32.mrb[0].mxu1 }
  0xda   :  { %v114_v8 = vadd.f32 %v167_v6, %v148_v5  ;;  %v130_v9 = vadd.f32 %v171_v7, %v148_v5  ;;  %v105_v10 = vpop.f32.mrb[1].mxu0  ;;  %v121_v11 = vpop.f32.mrb[1].mxu1 }
  0xdb   :  { %v106_v12 = vadd.f32 %v148_v5, %v105_v10  ;;  %v122_v13 = vadd.f32 %v148_v5, %v121_v11  ;;  %v168_v14 = vpop.f32.mrb[2].mxu0  ;;  %v172_v15 = vpop.f32.mrb[2].mxu1 }
  0xdc   :  { %138 = vst [vmem:[%s245_s3 + $0x10] sm:$0xff] %v114_v8  ;;  %142 = vst [vmem:[%s245_s3 + $0x30] sm:$0xff] %v130_v9  ;;  %v117_v16 = vadd.f32 %v168_v14, %v148_v5  ;;  %v133_v17 = vadd.f32 %v172_v15, %v148_v5  ;;  %v108_v18 = vpop.f32.mrb[3].mxu0  ;;  %v124_v19 = vpop.f32.mrb[3].mxu1 }
  0xdd   :  { %136 = vst [vmem:[%s245_s3] sm:$0xff] %v106_v12  ;;  %140 = vst [vmem:[%s245_s3 + $0x20] sm:$0xff] %v122_v13  ;;  %v109_v20 = vadd.f32 %v148_v5, %v108_v18  ;;  %v125_v21 = vadd.f32 %v148_v5, %v124_v19 }
  0xde   :  { %139 = vst [vmem:[%s245_s3 + $0x18] sm:$0xff] %v117_v16  ;;  %143 = vst [vmem:[%s245_s3 + $0x38] sm:$0xff] %v133_v17 }
  0xdf   :  { %137 = vst [vmem:[%s245_s3 + $0x8] sm:$0xff] %v109_v20  ;;  %141 = vst [vmem:[%s245_s3 + $0x28] sm:$0xff] %v125_v21 }

// kernel: forward.9
= control target key start
LH: loop header
LB: loop body
LE: loop exit
PB: predicated region body
PF: predicated region fallthrough
CT: control target
= control target key end

     0   :  { %v105_v0 = vmov 0.0   ;;  %vm106_vm0 = vmmov 0   ;;  %vm32_vm1 = vcmask 130048   ;;  %s142_s1 = inlined_call_operand.vmem [shape: bf16[16,16], index: 1, kind: input, shape index: {}]   ;;  %s143_s0 = inlined_call_operand.vmem [shape: f32[8,16], index: 0, kind: input, shape index: {}]   ;;  %s144_s2 = inlined_call_operand.vmem [shape: f32[1,16], index: 2, kind: input, shape index: {}]   ;;  %s145_s3 = inlined_call_operand.vmem [shape: f32[8,16], index: 3, kind: output, shape index: {}]  }
   0x1   :  { %94 = vmatprep.subr.bf16.mxu0 %v105_v0  ;;  %v102_v1 = vld [vmem:[%s142_s1] sm:$0xff]   ;;  %96 = vmatprep.mubr.msk.bf16.mxu0 %vm106_vm0, %v105_v0 }
   0x2   :  { %v15_v2 = vld [vmem:[%s143_s0] sm:$0xff]  ;;  %95 = vmatpush3.bf16.msra.mxu0 %v102_v1 }
   0x3   :  { %v16_v3 = vpack.c.bf16 %v15_v2, %v15_v2  ;;  %v89_v4 = vld [vmem:[%s144_s2] ss:$0 sm:$0xff] }
   0x5   :  { %97 = vmatmul.mubr.msk.bf16.vlgmr.msra.gmra.mrb[0].mxu0 %vm32_vm1, %v16_v3 }
  0xd8   :  { %v70_v5 = vpop.f32.mrb[0].mxu0 }
  0xd9   :  { %v71_v6 = vadd.f32 %v89_v4, %v70_v5  ;;  %v98_v7 = vpop.f32.mrb[1].mxu0 }
  0xda   :  { %v73_v8 = vpop.f32.mrb[2].mxu0 }
  0xdb   :  { %v76_v9 = vmax.f32 %v71_v6, 0.0  ;;  %v99_v10 = vpop.f32.mrb[3].mxu0 }
  0xdd   :  { %v77_v11 = vmul.f32 %v76_v9, %v76_v9 }
  0xdf   :  { %v78_v12 = vsel %vm32_vm1, %v77_v11, 0.0 }
  0xe0   :  { %79 = vadd.xlane.f32.xlu0 %v78_v12 }
 0x16d   :  { %v80_v13 = vpop.xlane.xlu0 %79 }
 0x16e   :  { %v81_v14 = vmax.f32 %v80_v13, 1e-24 }
 0x170   :  { %103 = vrsqrt.f32 %v81_v14 }
 0x17a   :  { %v104_v15 = vpop.eup %103 }
 0x17b   :  { %v83_v16 = vmul.f32 %v104_v15, %v76_v9 }
 0x17d   :  { %84 = vst.msk [vmem:[%s145_s3] sm:$0xff] %vm32_vm1, %v83_v16 }

// kernel: forward.6
= control target key start
LH: loop header
LB: loop body
LE: loop exit
PB: predicated region body
PF: predicated region fallthrough
CT: control target
= control target key end

     0   :  { %vm19_vm0 = vcmask 130048   ;;  %v1288_v0 = vmov 0.0   ;;  %vm1289_vm1 = vmmov 0   ;;  %vm21_vm2 = vcmask 261120   ;;  %s1290_s15 = smov 64   ;;  %s1291_s16 = smov 32   ;;  %s1519_s1 = inlined_call_operand.vmem [shape: bf16[16,128], index: 1, kind: input, shape index: {}]   ;;  %s1520_s0 = inlined_call_operand.vmem [shape: f32[8,8,128], index: 0, kind: input, shape index: {}]   ;;  %s1521_s2 = inlined_call_operand.vmem [shape: bf16[32,16], index: 2, kind: input, shape index: {}]   ;;  %s1522_s3 = inlined_call_operand.vmem [shape: f32[8,8,16], index: 3, kind: output, shape index: {}]  }
   0x1   :  { %1104 = vmatprep.subr.bf16.mxu0 %v1288_v0  ;;  %v1317_v1 = vld [vmem:[%s1519_s1] sm:$0xff]   ;;  %1106 = vmatprep.mubr.msk.bf16.mxu0 %vm1289_vm1, %v1288_v0  ;;  %20 = vst.msk [vmem:[#allocation2] sm:$0xff] %vm19_vm0, %v1288_v0  ;;  %v1350_v23 = vld [vmem:[%s1521_s2 + $0x8] sm:$0xff]   ;;  %v1034_v60 = vld [vmem:[%s1520_s0 + $0x10] sm:$0xff] }
   0x2   :  { %1110 = vmatprep.subr.bf16.mxu1 %v1288_v0  ;;  %1114 = vmatprep.mubr.msk.bf16.mxu1 %vm1289_vm1, %v1288_v0  ;;  %22 = vst.msk [vmem:[#allocation3] sm:$0xff] %vm21_vm2, %v1288_v0  ;;  %v31_v4 = vld [vmem:[%s1520_s0] sm:$0xff]  ;;  %v1029_v34 = vld [vmem:[%s1520_s0 + $0x8] sm:$0xff] }
   0x3   :  { %1105 = vmatpush3.bf16.msra.mxu0 %v1317_v1  ;;  %v1344_v22 = vld [vmem:[%s1521_s2] sm:$0xff]  }
   0x4   :  { %1118 = vmatprep.subr.bf16.mxu0 %v1288_v0  ;;  %1111 = vmatpush3.bf16.msra.mxu1 %v1344_v22 }
   0x5   :  { %1112 = vmatprep.subr.bf16.mxu1 %v1288_v0 }
   0x8   :  { %v29_v2 = vld [vmem:[#allocation2] sm:$0xff]  ;;  %1113 = vmatpush3.bf16.msra.mxu1 %v1350_v23 }
   0x9   :  { %v32_v3 = vpack.c.bf16 %v29_v2, %v29_v2  ;;  %v30_v11 = vld [vmem:[#allocation3] sm:$0xff]  ;;  %1124 = vmatprep.subr.bf16.mxu1 %v1288_v0 }
   0xb   :  { %1107 = vmatmul.mubr.msk.bf16.vlgmr.msra.gmra.mrb[0].mxu0 %vm19_vm0, %v32_v3 }
   0xc   :  { %1119 = vmatpush3.bf16.msra.mxu0 %v1317_v1  ;;  %1120 = vmatprep.mubr.msk.bf16.mxu0 %vm1289_vm1, %v1288_v0 }
   0xd   :  { %1132 = vmatprep.subr.bf16.mxu0 %v1288_v0 }
  0xde   :  { %v77_v5 = vpop.f32.mrb[0].mxu0 }
  0xdf   :  { %v83_v6 = vadd.f32 %v77_v5, %v31_v4  ;;  %v1108_v7 = vpop.f32.mrb[1].mxu0 }
  0xe0   :  { %v80_v8 = vpop.f32.mrb[2].mxu0 }
  0xe1   :  { %1224 = vtanh.f32 %v83_v6  ;;  %v1109_v9 = vpop.f32.mrb[3].mxu0  ;;  %v1025_v12 = vmul.f32 -1.442695, %v83_v6 }
  0xe3   :  { %1226 = vpow2.f32 %v1025_v12 }
  0xeb   :  { %v1225_v10 = vpop.eup %1224 }
  0xec   :  { %97 = vrot.lane.b32.xlu0 %v1225_v10, %s1290_s15 }
  0xed   :  { %v1227_v13 = vpop.eup %1226 }
  0xee   :  { %v87_v14 = vadd.f32 1.0, %v1227_v13 }
  0xf0   :  { %92 = vrot.lane.b32.xlu0 %v30_v11, %s1291_s16  ;;  %1228 = vrcp.f32 %v87_v14 }
  0xfa   :  { %v1229_v15 = vpop.eup %1228 }
 0x15e   :  { %v98_v16 = vpop.permute.xlu0 %97 }
 0x15f   :  { %v100_v17 = vmul.f32 %v1229_v15, %v98_v16 }
 0x161   :  { %102 = vrot.lane.b32.xlu1 %v100_v17, %s1291_s16 }
 0x162   :  { %v93_v18 = vpop.permute.xlu0 %92 }
 0x163   :  { %v95_v19 = vmul.f32 %v1229_v15, %v93_v18 }
 0x1d3   :  { %v103_v20 = vpop.permute.xlu1 %102 }
 0x1d4   :  { %v105_v21 = vadd.f32 %v103_v20, %v95_v19 }
 0x1d6   :  { %1230 = vtanh.f32 %v105_v21 }
 0x1e0   :  { %v1231_v24 = vpop.eup %1230 }
 0x1e1   :  { %108 = vrot.lane.b32.xlu1 %v1231_v24, %s1290_s15 }
 0x253   :  { %v109_v25 = vpop.permute.xlu1 %108 }
 0x254   :  { %v111_v26 = vmul.f32 %v1229_v15, %v109_v25 }
 0x256   :  { %v112_v27 = vpack.c.bf16 %v111_v26, %v111_v26  ;;  %v1039_v26 = vld [vmem:[%s1520_s0 + $0x18] sm:$0xff] }
 0x258   :  { %114 = vrot.lane.b32.xlu0 %v112_v27, %s1291_s16 }
 0x2ca   :  { %v115_v28 = vpop.permute.xlu0 %114 }
 0x2cb   :  { %1115 = vmatmul.mubr.msk.bf16.vlgmr.msra.gmra.mrb[0].mxu1 %vm21_vm2, %v115_v28 }
 0x2cc   :  { %1125 = vmatpush3.bf16.msra.mxu1 %v1344_v22  ;;  %1128 = vmatprep.mubr.msk.bf16.mxu1 %vm1289_vm1, %v1288_v0 }
 0x2cd   :  { %1126 = vmatprep.subr.bf16.mxu1 %v1288_v0 }
 0x2d0   :  { %1127 = vmatpush3.bf16.msra.mxu1 %v1350_v23 }
 0x2d1   :  { %1138 = vmatprep.subr.bf16.mxu1 %v1288_v0 }
 0x39e   :  { %v166_v29 = vpop.f32.mrb[0].mxu1 }
 0x39f   :  { %172 = vst.msk [vmem:[%s1522_s3] sm:$0xff] %vm19_vm0, %v166_v29  ;;  %v175_v30 = vpack.c.bf16 %v166_v29, %v166_v29  ;;  %v1116_v31 = vpop.f32.mrb[1].mxu1 }
 0x3a0   :  { %v169_v32 = vpop.f32.mrb[2].mxu1 }
 0x3a1   :  { %v1117_v33 = vpop.f32.mrb[3].mxu1  ;;  %1121 = vmatmul.mubr.msk.bf16.vlgmr.msra.gmra.mrb[4].mxu0 %vm19_vm0, %v175_v30 }
 0x3a2   :  { %1133 = vmatpush3.bf16.msra.mxu0 %v1317_v1  ;;  %1134 = vmatprep.mubr.msk.bf16.mxu0 %vm1289_vm1, %v1288_v0 }
 0x3a3   :  { %1146 = vmatprep.subr.bf16.mxu0 %v1288_v0 }
 0x474   :  { %v213_v35 = vpop.f32.mrb[4].mxu0 }
 0x475   :  { %v219_v36 = vadd.f32 %v1029_v34, %v213_v35  ;;  %v1122_v37 = vpop.f32.mrb[5].mxu0 }
 0x476   :  { %v216_v38 = vpop.f32.mrb[6].mxu0 }
 0x477   :  { %1232 = vtanh.f32 %v219_v36  ;;  %v1123_v39 = vpop.f32.mrb[7].mxu0  ;;  %v1031_v41 = vmul.f32 -1.442695, %v219_v36 }
 0x479   :  { %1234 = vpow2.f32 %v1031_v41 }
 0x481   :  { %v1233_v40 = vpop.eup %1232 }
 0x482   :  { %229 = vrot.lane.b32.xlu1 %v1233_v40, %s1290_s15 }
 0x483   :  { %v1235_v42 = vpop.eup %1234 }
 0x484   :  { %v223_v43 = vadd.f32 1.0, %v1235_v42 }
 0x486   :  { %1236 = vrcp.f32 %v223_v43 }
 0x490   :  { %v1237_v44 = vpop.eup %1236 }
 0x491   :  { %v227_v47 = vmul.f32 %v1237_v44, %v105_v21 }
 0x4f4   :  { %v230_v45 = vpop.permute.xlu1 %229 }
 0x4f5   :  { %v232_v46 = vmul.f32 %v1237_v44, %v230_v45 }
 0x4f7   :  { %234 = vrot.lane.b32.xlu0 %v232_v46, %s1291_s16 }
 0x569   :  { %v235_v48 = vpop.permute.xlu0 %234 }
 0x56a   :  { %v237_v49 = vadd.f32 %v235_v48, %v227_v47 }
 0x56c   :  { %1238 = vtanh.f32 %v237_v49 }
 0x576   :  { %v1239_v50 = vpop.eup %1238 }
 0x577   :  { %240 = vrot.lane.b32.xlu1 %v1239_v50, %s1290_s15 }
 0x5e9   :  { %v241_v51 = vpop.permute.xlu1 %240 }
 0x5ea   :  { %v243_v52 = vmul.f32 %v1237_v44, %v241_v51 }
 0x5ec   :  { %v244_v53 = vpack.c.bf16 %v243_v52, %v243_v52  ;;  %v1044_v52 = vld [vmem:[%s1520_s0 + $0x20] sm:$0xff] }
 0x5ee   :  { %246 = vrot.lane.b32.xlu0 %v244_v53, %s1291_s16 }
 0x660   :  { %v247_v54 = vpop.permute.xlu0 %246 }
 0x661   :  { %1129 = vmatmul.mubr.msk.bf16.vlgmr.msra.gmra.mrb[4].mxu1 %vm21_vm2, %v247_v54 }
 0x662   :  { %1139 = vmatpush3.bf16.msra.mxu1 %v1344_v22  ;;  %1142 = vmatprep.mubr.msk.bf16.mxu1 %vm1289_vm1, %v1288_v0 }
 0x663   :  { %1140 = vmatprep.subr.bf16.mxu1 %v1288_v0 }
 0x666   :  { %1141 = vmatpush3.bf16.msra.mxu1 %v1350_v23 }
 0x667   :  { %1152 = vmatprep.subr.bf16.mxu1 %v1288_v0 }
 0x734   :  { %v285_v55 = vpop.f32.mrb[4].mxu1 }
 0x735   :  { %1033 = vst.msk [vmem:[%s1522_s3 + $0x8] sm:$0xff] %vm19_vm0, %v285_v55  ;;  %v295_v56 = vpack.c.bf16 %v285_v55, %v285_v55  ;;  %v1130_v57 = vpop.f32.mrb[5].mxu1 }
 0x736   :  { %v288_v58 = vpop.f32.mrb[6].mxu1 }
 0x737   :  { %v1131_v59 = vpop.f32.mrb[7].mxu1  ;;  %1135 = vmatmul.mubr.msk.bf16.vlgmr.msra.gmra.mrb[8].mxu0 %vm19_vm0, %v295_v56 }
 0x738   :  { %1147 = vmatpush3.bf16.msra.mxu0 %v1317_v1  ;;  %1148 = vmatprep.mubr.msk.bf16.mxu0 %vm1289_vm1, %v1288_v0 }
 0x739   :  { %1160 = vmatprep.subr.bf16.mxu0 %v1288_v0 }
 0x80a   :  { %v333_v61 = vpop.f32.mrb[8].mxu0 }
 0x80b   :  { %v339_v62 = vadd.f32 %v1034_v60, %v333_v61  ;;  %v1136_v63 = vpop.f32.mrb[9].mxu0 }
 0x80c   :  { %v336_v2 = vpop.f32.mrb[10].mxu0 }
 0x80d   :  { %1240 = vtanh.f32 %v339_v62  ;;  %v1137_v3 = vpop.f32.mrb[11].mxu0  ;;  %v1036_v5 = vmul.f32 -1.442695, %v339_v62 }
 0x80f   :  { %1242 = vpow2.f32 %v1036_v5 }
 0x817   :  { %v1241_v4 = vpop.eup %1240 }
 0x818   :  { %349 = vrot.lane.b32.xlu1 %v1241_v4, %s1290_s15 }
 0x819   :  { %v1243_v6 = vpop.eup %1242 }
 0x81a   :  { %v343_v7 = vadd.f32 1.0, %v1243_v6 }
 0x81c   :  { %1244 = vrcp.f32 %v343_v7 }
 0x826   :  { %v1245_v8 = vpop.eup %1244 }
 0x827   :  { %v347_v11 = vmul.f32 %v1245_v8, %v237_v49 }
 0x88a   :  { %v350_v9 = vpop.permute.xlu1 %349 }
 0x88b   :  { %v352_v10 = vmul.f32 %v1245_v8, %v350_v9 }
 0x88d   :  { %354 = vrot.lane.b32.xlu0 %v352_v10, %s1291_s16 }
 0x8ff   :  { %v355_v12 = vpop.permute.xlu0 %354 }
 0x900   :  { %v357_v13 = vadd.f32 %v355_v12, %v347_v11 }
 0x902   :  { %1246 = vtanh.f32 %v357_v13 }
 0x90c   :  { %v1247_v14 = vpop.eup %1246 }
 0x90d   :  { %360 = vrot.lane.b32.xlu1 %v1247_v14, %s1290_s15 }
 0x97f   :  { %v361_v15 = vpop.permute.xlu1 %360 }
 0x980   :  { %v363_v16 = vmul.f32 %v1245_v8, %v361_v15 }
 0x982   :  { %v364_v17 = vpack.c.bf16 %v363_v16, %v363_v16  ;;  %v1049_v16 = vld [vmem:[%s1520_s0 + $0x28] sm:$0xff] }
 0x984   :  { %366 = vrot.lane.b32.xlu0 %v364_v17, %s1291_s16 }
 0x9f6   :  { %v367_v18 = vpop.permute.xlu0 %366 }
 0x9f7   :  { %1143 = vmatmul.mubr.msk.bf16.vlgmr.msra.gmra.mrb[8].mxu1 %vm21_vm2, %v367_v18 }
 0x9f8   :  { %1153 = vmatpush3.bf16.msra.mxu1 %v1344_v22  ;;  %1156 = vmatprep.mubr.msk.bf16.mxu1 %vm1289_vm1, %v1288_v0 }
 0x9f9   :  { %1154 = vmatprep.subr.bf16.mxu1 %v1288_v0 }
 0x9fc   :  { %1155 = vmatpush3.bf16.msra.mxu1 %v1350_v23 }
 0x9fd   :  { %1166 = vmatprep.subr.bf16.mxu1 %v1288_v0 }
 0xaca   :  { %v405_v19 = vpop.f32.mrb[8].mxu1 }
 0xacb   :  { %1038 = vst.msk [vmem:[%s1522_s3 + $0x10] sm:$0xff] %vm19_vm0, %v405_v19  ;;  %v415_v20 = vpack.c.bf16 %v405_v19, %v405_v19  ;;  %v1144_v21 = vpop.f32.mrb[9].mxu1 }
 0xacc   :  { %v408_v24 = vpop.f32.mrb[10].mxu1 }
 0xacd   :  { %v1145_v25 = vpop.f32.mrb[11].mxu1  ;;  %1149 = vmatmul.mubr.msk.bf16.vlgmr.msra.gmra.mrb[12].mxu0 %vm19_vm0, %v415_v20 }
 0xace   :  { %1161 = vmatpush3.bf16.msra.mxu0 %v1317_v1  ;;  %1162 = vmatprep.mubr.msk.bf16.mxu0 %vm1289_vm1, %v1288_v0 }
 0xacf   :  { %1174 = vmatprep.subr.bf16.mxu0 %v1288_v0 }
 0xba0   :  { %v453_v27 = vpop.f32.mrb[12].mxu0 }
 0xba1   :  { %v459_v28 = vadd.f32 %v1039_v26, %v453_v27  ;;  %v1150_v29 = vpop.f32.mrb[13].mxu0 }
 0xba2   :  { %v456_v30 = vpop.f32.mrb[14].mxu0 }
 0xba3   :  { %1248 = vtanh.f32 %v459_v28  ;;  %v1151_v31 = vpop.f32.mrb[15].mxu0  ;;  %v1041_v33 = vmul.f32 -1.442695, %v459_v28 }
 0xba5   :  { %1250 = vpow2.f32 %v1041_v33 }
 0xbad   :  { %v1249_v32 = vpop.eup %1248 }
 0xbae   :  { %469 = vrot.lane.b32.xlu1 %v1249_v32, %s1290_s15 }
 0xbaf   :  { %v1251_v34 = vpop.eup %1250 }
 0xbb0   :  { %v463_v35 = vadd.f32 1.0, %v1251_v34 }
 0xbb2   :  { %1252 = vrcp.f32 %v463_v35 }
 0xbbc   :  { %v1253_v36 = vpop.eup %1252 }
 0xbbd   :  { %v467_v39 = vmul.f32 %v1253_v36, %v357_v13 }
 0xc20   :  { %v470_v37 = vpop.permute.xlu1 %469 }
 0xc21   :  { %v472_v38 = vmul.f32 %v1253_v36, %v470_v37 }
 0xc23   :  { %474 = vrot.lane.b32.xlu0 %v472_v38, %s1291_s16 }
 0xc95   :  { %v475_v40 = vpop.permute.xlu0 %474 }
 0xc96   :  { %v477_v41 = vadd.f32 %v475_v40, %v467_v39 }
 0xc98   :  { %1254 = vtanh.f32 %v477_v41 }
 0xca2   :  { %v1255_v42 = vpop.eup %1254 }
 0xca3   :  { %480 = vrot.lane.b32.xlu1 %v1255_v42, %s1290_s15 }
 0xd15   :  { %v481_v43 = vpop.permute.xlu1 %480 }
 0xd16   :  { %v483_v44 = vmul.f32 %v1253_v36, %v481_v43 }
 0xd18   :  { %v484_v45 = vpack.c.bf16 %v483_v44, %v483_v44  ;;  %v1054_v44 = vld [vmem:[%s1520_s0 + $0x30] sm:$0xff] }
 0xd1a   :  { %486 = vrot.lane.b32.xlu0 %v484_v45, %s1291_s16 }
 0xd8c   :  { %v487_v46 = vpop.permute.xlu0 %486 }
 0xd8d   :  { %1157 = vmatmul.mubr.msk.bf16.vlgmr.msra.gmra.mrb[12].mxu1 %vm21_vm2, %v487_v46 }
 0xd8e   :  { %1167 = vmatpush3.bf16.msra.mxu1 %v1344_v22  ;;  %1170 = vmatprep.mubr.msk.bf16.mxu1 %vm1289_vm1, %v1288_v0 }
 0xd8f   :  { %1168 = vmatprep.subr.bf16.mxu1 %v1288_v0 }
 0xd92   :  { %1169 = vmatpush3.bf16.msra.mxu1 %v1350_v23 }
 0xd93   :  { %1180 = vmatprep.subr.bf16.mxu1 %v1288_v0 }
 0xe60   :  { %v525_v47 = vpop.f32.mrb[12].mxu1 }
 0xe61   :  { %1043 = vst.msk [vmem:[%s1522_s3 + $0x18] sm:$0xff] %vm19_vm0, %v525_v47  ;;  %v535_v48 = vpack.c.bf16 %v525_v47, %v525_v47  ;;  %v1158_v49 = vpop.f32.mrb[13].mxu1 }
 0xe62   :  { %v528_v50 = vpop.f32.mrb[14].mxu1 }
 0xe63   :  { %v1159_v51 = vpop.f32.mrb[15].mxu1  ;;  %1163 = vmatmul.mubr.msk.bf16.vlgmr.msra.gmra.mrb[16].mxu0 %vm19_vm0, %v535_v48 }
 0xe64   :  { %1175 = vmatpush3.bf16.msra.mxu0 %v1317_v1  ;;  %1176 = vmatprep.mubr.msk.bf16.mxu0 %vm1289_vm1, %v1288_v0 }
 0xe65   :  { %1188 = vmatprep.subr.bf16.mxu0 %v1288_v0 }
 0xf36   :  { %v573_v53 = vpop.f32.mrb[16].mxu0 }
 0xf37   :  { %v579_v54 = vadd.f32 %v1044_v52, %v573_v53  ;;  %v1164_v55 = vpop.f32.mrb[17].mxu0 }
 0xf38   :  { %v576_v56 = vpop.f32.mrb[18].mxu0 }
 0xf39   :  { %1256 = vtanh.f32 %v579_v54  ;;  %v1165_v57 = vpop.f32.mrb[19].mxu0  ;;  %v1046_v59 = vmul.f32 -1.442695, %v579_v54 }
 0xf3b   :  { %1258 = vpow2.f32 %v1046_v59 }
 0xf43   :  { %v1257_v58 = vpop.eup %1256 }
 0xf44   :  { %589 = vrot.lane.b32.xlu1 %v1257_v58, %s1290_s15 }
 0xf45   :  { %v1259_v60 = vpop.eup %1258 }
 0xf46   :  { %v583_v61 = vadd.f32 1.0, %v1259_v60 }
 0xf48   :  { %1260 = vrcp.f32 %v583_v61 }
 0xf52   :  { %v1261_v62 = vpop.eup %1260 }
 0xf53   :  { %v587_v3 = vmul.f32 %v1261_v62, %v477_v41 }
 0xfb6   :  { %v590_v63 = vpop.permute.xlu1 %589 }
 0xfb7   :  { %v592_v2 = vmul.f32 %v1261_v62, %v590_v63 }
 0xfb9   :  { %594 = vrot.lane.b32.xlu0 %v592_v2, %s1291_s16 }
0x102b   :  { %v595_v4 = vpop.permute.xlu0 %594 }
0x102c   :  { %v597_v5 = vadd.f32 %v595_v4, %v587_v3 }
0x102e   :  { %1262 = vtanh.f32 %v597_v5 }
0x1038   :  { %v1263_v6 = vpop.eup %1262 }
0x1039   :  { %600 = vrot.lane.b32.xlu1 %v1263_v6, %s1290_s15 }
0x10ab   :  { %v601_v7 = vpop.permute.xlu1 %600 }
0x10ac   :  { %v603_v8 = vmul.f32 %v1261_v62, %v601_v7 }
0x10ae   :  { %v604_v9 = vpack.c.bf16 %v603_v8, %v603_v8 }
0x10b0   :  { %606 = vrot.lane.b32.xlu0 %v604_v9, %s1291_s16 }
0x1122   :  { %v607_v10 = vpop.permute.xlu0 %606 }
0x1123   :  { %1171 = vmatmul.mubr.msk.bf16.vlgmr.msra.gmra.mrb[16].mxu1 %vm21_vm2, %v607_v10 }
0x1124   :  { %1181 = vmatpush3.bf16.msra.mxu1 %v1344_v22  ;;  %1184 = vmatprep.mubr.msk.bf16.mxu1 %vm1289_vm1, %v1288_v0 }
0x1125   :  { %1182 = vmatprep.subr.bf16.mxu1 %v1288_v0 }
0x1128   :  { %1183 = vmatpush3.bf16.msra.mxu1 %v1350_v23 }
0x1129   :  { %1194 = vmatprep.subr.bf16.mxu1 %v1288_v0 }
0x11f6   :  { %v645_v11 = vpop.f32.mrb[16].mxu1 }
0x11f7   :  { %1048 = vst.msk [vmem:[%s1522_s3 + $0x20] sm:$0xff] %vm19_vm0, %v645_v11  ;;  %v655_v12 = vpack.c.bf16 %v645_v11, %v645_v11  ;;  %v1172_v13 = vpop.f32.mrb[17].mxu1 }
0x11f8   :  { %v648_v14 = vpop.f32.mrb[18].mxu1 }
0x11f9   :  { %v1173_v15 = vpop.f32.mrb[19].mxu1  ;;  %1177 = vmatmul.mubr.msk.bf16.vlgmr.msra.gmra.mrb[20].mxu0 %vm19_vm0, %v655_v12 }
0x11fa   :  { %1189 = vmatpush3.bf16.msra.mxu0 %v1317_v1  ;;  %1190 = vmatprep.mubr.msk.bf16.mxu0 %vm1289_vm1, %v1288_v0 }
0x11fb   :  { %1202 = vmatprep.subr.bf16.mxu0 %v1288_v0 }
0x12cc   :  { %v693_v17 = vpop.f32.mrb[20].mxu0 }
0x12cd   :  { %v699_v18 = vadd.f32 %v1049_v16, %v693_v17  ;;  %v1178_v19 = vpop.f32.mrb[21].mxu0 }
0x12ce   :  { %v696_v20 = vpop.f32.mrb[22].mxu0 }
0x12cf   :  { %1264 = vtanh.f32 %v699_v18  ;;  %v1179_v21 = vpop.f32.mrb[23].mxu0  ;;  %v1051_v25 = vmul.f32 -1.442695, %v699_v18 }
0x12d1   :  { %1266 = vpow2.f32 %v1051_v25 }
0x12d9   :  { %v1265_v24 = vpop.eup %1264 }
0x12da   :  { %709 = vrot.lane.b32.xlu1 %v1265_v24, %s1290_s15 }
0x12db   :  { %v1267_v26 = vpop.eup %1266 }
0x12dc   :  { %v703_v27 = vadd.f32 1.0, %v1267_v26 }
0x12de   :  { %1268 = vrcp.f32 %v703_v27 }
0x12e8   :  { %v1269_v28 = vpop.eup %1268 }
0x12e9   :  { %v707_v31 = vmul.f32 %v1269_v28, %v597_v5 }
0x134c   :  { %v710_v29 = vpop.permute.xlu1 %709 }
0x134d   :  { %v712_v30 = vmul.f32 %v1269_v28, %v710_v29 }
0x134f   :  { %714 = vrot.lane.b32.xlu0 %v712_v30, %s1291_s16 }
0x13c1   :  { %v715_v32 = vpop.permute.xlu0 %714 }
0x13c2   :  { %v717_v33 = vadd.f32 %v715_v32, %v707_v31 }
0x13c4   :  { %1270 = vtanh.f32 %v717_v33 }
0x13ce   :  { %v1271_v34 = vpop.eup %1270 }
0x13cf   :  { %720 = vrot.lane.b32.xlu1 %v1271_v34, %s1290_s15 }
0x1441   :  { %v721_v35 = vpop.permute.xlu1 %720 }
0x1442   :  { %v723_v36 = vmul.f32 %v1269_v28, %v721_v35 }
0x1444   :  { %v724_v37 = vpack.c.bf16 %v723_v36, %v723_v36 }
0x1446   :  { %726 = vrot.lane.b32.xlu0 %v724_v37, %s1291_s16 }
0x14b8   :  { %v727_v38 = vpop.permute.xlu0 %726 }
0x14b9   :  { %1185 = vmatmul.mubr.msk.bf16.vlgmr.msra.gmra.mrb[20].mxu1 %vm21_vm2, %v727_v38 }
0x14ba   :  { %1195 = vmatpush3.bf16.msra.mxu1 %v1344_v22  ;;  %1198 = vmatprep.mubr.msk.bf16.mxu1 %vm1289_vm1, %v1288_v0 }
0x14bb   :  { %1196 = vmatprep.subr.bf16.mxu1 %v1288_v0 }
0x14be   :  { %1197 = vmatpush3.bf16.msra.mxu1 %v1350_v23 }
0x14bf   :  { %1208 = vmatprep.subr.bf16.mxu1 %v1288_v0 }
0x158c   :  { %v765_v39 = vpop.f32.mrb[20].mxu1 }
0x158d   :  { %1053 = vst.msk [vmem:[%s1522_s3 + $0x28] sm:$0xff] %vm19_vm0, %v765_v39  ;;  %v775_v40 = vpack.c.bf16 %v765_v39, %v765_v39  ;;  %v1186_v41 = vpop.f32.mrb[21].mxu1 }
0x158e   :  { %v768_v42 = vpop.f32.mrb[22].mxu1 }
0x158f   :  { %v1187_v43 = vpop.f32.mrb[23].mxu1  ;;  %1191 = vmatmul.mubr.msk.bf16.vlgmr.msra.gmra.mrb[24].mxu0 %vm19_vm0, %v775_v40 }
0x1590   :  { %1203 = vmatpush3.bf16.msra.mxu0 %v1317_v1  ;;  %1204 = vmatprep.mubr.msk.bf16.mxu0 %vm1289_vm1, %v1288_v0 }
0x1662   :  { %v813_v45 = vpop.f32.mrb[24].mxu0 }
0x1663   :  { %v819_v46 = vadd.f32 %v1054_v44, %v813_v45  ;;  %v1192_v47 = vpop.f32.mrb[25].mxu0 }
0x1664   :  { %v816_v48 = vpop.f32.mrb[26].mxu0 }
0x1665   :  { %1272 = vtanh.f32 %v819_v46  ;;  %v1193_v49 = vpop.f32.mrb[27].mxu0  ;;  %v1056_v51 = vmul.f32 -1.442695, %v819_v46 }
0x1667   :  { %1274 = vpow2.f32 %v1056_v51 }
0x166f   :  { %v1273_v50 = vpop.eup %1272 }
0x1670   :  { %829 = vrot.lane.b32.xlu1 %v1273_v50, %s1290_s15 }
0x1671   :  { %v1275_v52 = vpop.eup %1274 }
0x1672   :  { %v823_v1 = vadd.f32 1.0, %v1275_v52 }
0x1674   :  { %1276 = vrcp.f32 %v823_v1 }
0x167e   :  { %v1277_v53 = vpop.eup %1276 }
0x167f   :  { %v827_v56 = vmul.f32 %v1277_v53, %v717_v33 }
0x16e2   :  { %v830_v54 = vpop.permute.xlu1 %829 }
0x16e3   :  { %v832_v55 = vmul.f32 %v1277_v53, %v830_v54 }
0x16e5   :  { %834 = vrot.lane.b32.xlu0 %v832_v55, %s1291_s16 }
0x1757   :  { %v835_v57 = vpop.permute.xlu0 %834 }
0x1758   :  { %v837_v58 = vadd.f32 %v835_v57, %v827_v56 }
0x175a   :  { %1278 = vtanh.f32 %v837_v58 }
0x1764   :  { %v1279_v59 = vpop.eup %1278 }
0x1765   :  { %840 = vrot.lane.b32.xlu1 %v1279_v59, %s1290_s15 }
0x17d7   :  { %v841_v60 = vpop.permute.xlu1 %840 }
0x17d8   :  { %v843_v61 = vmul.f32 %v1277_v53, %v841_v60 }
0x17da   :  { %v844_v62 = vpack.c.bf16 %v843_v61, %v843_v61 }
0x17dc   :  { %846 = vrot.lane.b32.xlu0 %v844_v62, %s1291_s16 }
0x184e   :  { %v847_v63 = vpop.permute.xlu0 %846 }
0x184f   :  { %1199 = vmatmul.mubr.msk.bf16.vlgmr.msra.gmra.mrb[24].mxu1 %vm21_vm2, %v847_v63 }
0x1850   :  { %1209 = vmatpush3.bf16.msra.mxu1 %v1344_v22  ;;  %1212 = vmatprep.mubr.msk.bf16.mxu1 %vm1289_vm1, %v1288_v0  ;;  %v1059_v22 = vld [vmem:[%s1520_s0 + $0x38] sm:$0xff]  ;;  %s1292_s0 = smov 96  }
0x1851   :  { %1210 = vmatprep.subr.bf16.mxu1 %v1288_v0 }
0x1854   :  { %1211 = vmatpush3.bf16.msra.mxu1 %v1350_v23 }
0x1922   :  { %v885_v2 = vpop.f32.mrb[24].mxu1 }
0x1923   :  { %1058 = vst.msk [vmem:[%s1522_s3 + $0x30] sm:$0xff] %vm19_vm0, %v885_v2  ;;  %v895_v3 = vpack.c.bf16 %v885_v2, %v885_v2  ;;  %v1200_v4 = vpop.f32.mrb[25].mxu1 }
0x1924   :  { %v888_v5 = vpop.f32.mrb[26].mxu1 }
0x1925   :  { %v1201_v6 = vpop.f32.mrb[27].mxu1  ;;  %1205 = vmatmul.mubr.msk.bf16.vlgmr.msra.gmra.mrb[28].mxu0 %vm19_vm0, %v895_v3 }
0x19f8   :  { %v933_v7 = vpop.f32.mrb[28].mxu0 }
0x19f9   :  { %v939_v0 = vadd.f32 %v1059_v22, %v933_v7  ;;  %v1206_v8 = vpop.f32.mrb[29].mxu0 }
0x19fa   :  { %v936_v23 = vpop.f32.mrb[30].mxu0 }
0x19fb   :  { %1280 = vtanh.f32 %v939_v0  ;;  %v1207_v9 = vpop.f32.mrb[31].mxu0  ;;  %v1061_v11 = vmul.f32 -1.442695, %v939_v0 }
0x19fd   :  { %1282 = vpow2.f32 %v1061_v11 }
0x1a05   :  { %v1281_v10 = vpop.eup %1280 }
0x1a06   :  { %949 = vrot.lane.b32.xlu1 %v1281_v10, %s1290_s15 }
0x1a07   :  { %v1283_v12 = vpop.eup %1282 }
0x1a08   :  { %v943_v13 = vadd.f32 1.0, %v1283_v12 }
0x1a0a   :  { %1284 = vrcp.f32 %v943_v13 }
0x1a14   :  { %v1285_v14 = vpop.eup %1284 }
0x1a15   :  { %v947_v17 = vmul.f32 %v1285_v14, %v837_v58 }
0x1a78   :  { %v950_v15 = vpop.permute.xlu1 %949 }
0x1a79   :  { %v952_v16 = vmul.f32 %v1285_v14, %v950_v15 }
0x1a7b   :  { %954 = vrot.lane.b32.xlu0 %v952_v16, %s1291_s16 }
0x1aed   :  { %v955_v18 = vpop.permute.xlu0 %954 }
0x1aee   :  { %v957_v19 = vadd.f32 %v955_v18, %v947_v17 }
0x1af0   :  { %1286 = vtanh.f32 %v957_v19 }
0x1afa   :  { %v1287_v20 = vpop.eup %1286 }
0x1afb   :  { %960 = vrot.lane.b32.xlu1 %v1287_v20, %s1290_s15 }
0x1aff   :  { %1015 = vrot.lane.b32.xlu1 %v957_v19, %s1292_s0 }
0x1b6d   :  { %v961_v21 = vpop.permute.xlu1 %960 }
0x1b6e   :  { %v963_v24 = vmul.f32 %v1285_v14, %v961_v21 }
0x1b70   :  { %v964_v25 = vpack.c.bf16 %v963_v24, %v963_v24 }
0x1b71   :  { %v1016_v26 = vpop.permute.xlu1 %1015 }
0x1b72   :  { %1018 = vst.msk [vmem:[#allocation3] sm:$0xff] %vm21_vm2, %v1016_v26  ;;  %966 = vrot.lane.b32.xlu0 %v964_v25, %s1291_s16 }
0x1be4   :  { %v967_v27 = vpop.permute.xlu0 %966 }
0x1be5   :  { %1213 = vmatmul.mubr.msk.bf16.vlgmr.msra.gmra.mrb[28].mxu1 %vm21_vm2, %v967_v27 }
0x1cb8   :  { %v1005_v28 = vpop.f32.mrb[28].mxu1 }
0x1cb9   :  { %1063 = vst.msk [vmem:[%s1522_s3 + $0x38] sm:$0xff] %vm19_vm0, %v1005_v28  ;;  %1013 = vst.msk [vmem:[#allocation2] sm:$0xff] %vm19_vm0, %v1005_v28  ;;  %v1214_v29 = vpop.f32.mrb[29].mxu1 }
0x1cba   :  { %v1008_v30 = vpop.f32.mrb[30].mxu1 }
0x1cbb   :  { %v1215_v31 = vpop.f32.mrb[31].mxu1 }

// kernel: forward.8
= control target key start
LH: loop header
LB: loop body
LE: loop exit
PB: predicated region body
PF: predicated region fallthrough
CT: control target
= control target key end

     0   :  { %vm19_vm0 = vcmask 130048   ;;  %v1267_v0 = vmov 0.0   ;;  %vm1268_vm1 = vmmov 0   ;;  %vm21_vm2 = vcmask 261120   ;;  %s1269_s15 = smov 64   ;;  %s1270_s16 = smov 32   ;;  %s1470_s1 = inlined_call_operand.vmem [shape: bf16[16,128], index: 1, kind: input, shape index: {}]   ;;  %s1471_s0 = inlined_call_operand.vmem [shape: f32[8,8,128], index: 0, kind: input, shape index: {}]   ;;  %s1472_s2 = inlined_call_operand.vmem [shape: bf16[32,16], index: 2, kind: input, shape index: {}]   ;;  %s1473_s3 = inlined_call_operand.vmem [shape: f32[8,16], index: 3, kind: output, shape index: {}]  }
   0x1   :  { %1083 = vmatprep.subr.bf16.mxu0 %v1267_v0  ;;  %v1296_v1 = vld [vmem:[%s1470_s1] sm:$0xff]   ;;  %1085 = vmatprep.mubr.msk.bf16.mxu0 %vm1268_vm1, %v1267_v0  ;;  %20 = vst.msk [vmem:[#allocation2] sm:$0xff] %vm19_vm0, %v1267_v0  ;;  %v1329_v23 = vld [vmem:[%s1472_s2 + $0x8] sm:$0xff]   ;;  %v1019_v60 = vld [vmem:[%s1471_s0 + $0x10] sm:$0xff] }
   0x2   :  { %1089 = vmatprep.subr.bf16.mxu1 %v1267_v0  ;;  %1093 = vmatprep.mubr.msk.bf16.mxu1 %vm1268_vm1, %v1267_v0  ;;  %22 = vst.msk [vmem:[#allocation3] sm:$0xff] %vm21_vm2, %v1267_v0  ;;  %v31_v4 = vld [vmem:[%s1471_s0] sm:$0xff]  ;;  %v1015_v34 = vld [vmem:[%s1471_s0 + $0x8] sm:$0xff] }
   0x3   :  { %1084 = vmatpush3.bf16.msra.mxu0 %v1296_v1  ;;  %v1323_v22 = vld [vmem:[%s1472_s2] sm:$0xff]  }
   0x4   :  { %1097 = vmatprep.subr.bf16.mxu0 %v1267_v0  ;;  %1090 = vmatpush3.bf16.msra.mxu1 %v1323_v22 }
   0x5   :  { %1091 = vmatprep.subr.bf16.mxu1 %v1267_v0 }
   0x8   :  { %v29_v2 = vld [vmem:[#allocation2] sm:$0xff]  ;;  %1092 = vmatpush3.bf16.msra.mxu1 %v1329_v23 }
   0x9   :  { %v32_v3 = vpack.c.bf16 %v29_v2, %v29_v2  ;;  %v30_v11 = vld [vmem:[#allocation3] sm:$0xff]  ;;  %1103 = vmatprep.subr.bf16.mxu1 %v1267_v0 }
   0xb   :  { %1086 = vmatmul.mubr.msk.bf16.vlgmr.msra.gmra.mrb[0].mxu0 %vm19_vm0, %v32_v3 }
   0xc   :  { %1098 = vmatpush3.bf16.msra.mxu0 %v1296_v1  ;;  %1099 = vmatprep.mubr.msk.bf16.mxu0 %vm1268_vm1, %v1267_v0 }
   0xd   :  { %1111 = vmatprep.subr.bf16.mxu0 %v1267_v0 }
  0xde   :  { %v77_v5 = vpop.f32.mrb[0].mxu0 }
  0xdf   :  { %v83_v6 = vadd.f32 %v77_v5, %v31_v4  ;;  %v1087_v7 = vpop.f32.mrb[1].mxu0 }
  0xe0   :  { %v80_v8 = vpop.f32.mrb[2].mxu0 }
  0xe1   :  { %1203 = vtanh.f32 %v83_v6  ;;  %v1088_v9 = vpop.f32.mrb[3].mxu0  ;;  %v1011_v12 = vmul.f32 -1.442695, %v83_v6 }
  0xe3   :  { %1205 = vpow2.f32 %v1011_v12 }
  0xeb   :  { %v1204_v10 = vpop.eup %1203 }
  0xec   :  { %97 = vrot.lane.b32.xlu0 %v1204_v10, %s1269_s15 }
  0xed   :  { %v1206_v13 = vpop.eup %1205 }
  0xee   :  { %v87_v14 = vadd.f32 1.0, %v1206_v13 }
  0xf0   :  { %92 = vrot.lane.b32.xlu0 %v30_v11, %s1270_s16  ;;  %1207 = vrcp.f32 %v87_v14 }
  0xfa   :  { %v1208_v15 = vpop.eup %1207 }
 0x15e   :  { %v98_v16 = vpop.permute.xlu0 %97 }
 0x15f   :  { %v100_v17 = vmul.f32 %v1208_v15, %v98_v16 }
 0x161   :  { %102 = vrot.lane.b32.xlu1 %v100_v17, %s1270_s16 }
 0x162   :  { %v93_v18 = vpop.permute.xlu0 %92 }
 0x163   :  { %v95_v19 = vmul.f32 %v1208_v15, %v93_v18 }
 0x1d3   :  { %v103_v20 = vpop.permute.xlu1 %102 }
 0x1d4   :  { %v105_v21 = vadd.f32 %v103_v20, %v95_v19 }
 0x1d6   :  { %1209 = vtanh.f32 %v105_v21 }
 0x1e0   :  { %v1210_v24 = vpop.eup %1209 }
 0x1e1   :  { %108 = vrot.lane.b32.xlu1 %v1210_v24, %s1269_s15 }
 0x253   :  { %v109_v25 = vpop.permute.xlu1 %108 }
 0x254   :  { %v111_v26 = vmul.f32 %v1208_v15, %v109_v25 }
 0x256   :  { %v112_v27 = vpack.c.bf16 %v111_v26, %v111_v26  ;;  %v1023_v26 = vld [vmem:[%s1471_s0 + $0x18] sm:$0xff] }
 0x258   :  { %114 = vrot.lane.b32.xlu0 %v112_v27, %s1270_s16 }
 0x2ca   :  { %v115_v28 = vpop.permute.xlu0 %114 }
 0x2cb   :  { %1094 = vmatmul.mubr.msk.bf16.vlgmr.msra.gmra.mrb[0].mxu1 %vm21_vm2, %v115_v28 }
 0x2cc   :  { %1104 = vmatpush3.bf16.msra.mxu1 %v1323_v22  ;;  %1107 = vmatprep.mubr.msk.bf16.mxu1 %vm1268_vm1, %v1267_v0 }
 0x2cd   :  { %1105 = vmatprep.subr.bf16.mxu1 %v1267_v0 }
 0x2d0   :  { %1106 = vmatpush3.bf16.msra.mxu1 %v1329_v23 }
 0x2d1   :  { %1117 = vmatprep.subr.bf16.mxu1 %v1267_v0 }
 0x39e   :  { %v166_v29 = vpop.f32.mrb[0].mxu1 }
 0x39f   :  { %v174_v30 = vpack.c.bf16 %v166_v29, %v166_v29  ;;  %v1095_v31 = vpop.f32.mrb[1].mxu1 }
 0x3a0   :  { %v169_v32 = vpop.f32.mrb[2].mxu1 }
 0x3a1   :  { %v1096_v33 = vpop.f32.mrb[3].mxu1  ;;  %1100 = vmatmul.mubr.msk.bf16.vlgmr.msra.gmra.mrb[4].mxu0 %vm19_vm0, %v174_v30 }
 0x3a2   :  { %1112 = vmatpush3.bf16.msra.mxu0 %v1296_v1  ;;  %1113 = vmatprep.mubr.msk.bf16.mxu0 %vm1268_vm1, %v1267_v0 }
 0x3a3   :  { %1125 = vmatprep.subr.bf16.mxu0 %v1267_v0 }
 0x474   :  { %v212_v35 = vpop.f32.mrb[4].mxu0 }
 0x475   :  { %v218_v36 = vadd.f32 %v1015_v34, %v212_v35  ;;  %v1101_v37 = vpop.f32.mrb[5].mxu0 }
 0x476   :  { %v215_v38 = vpop.f32.mrb[6].mxu0 }
 0x477   :  { %1211 = vtanh.f32 %v218_v36  ;;  %v1102_v39 = vpop.f32.mrb[7].mxu0  ;;  %v1017_v41 = vmul.f32 -1.442695, %v218_v36 }
 0x479   :  { %1213 = vpow2.f32 %v1017_v41 }
 0x481   :  { %v1212_v40 = vpop.eup %1211 }
 0x482   :  { %228 = vrot.lane.b32.xlu1 %v1212_v40, %s1269_s15 }
 0x483   :  { %v1214_v42 = vpop.eup %1213 }
 0x484   :  { %v222_v43 = vadd.f32 1.0, %v1214_v42 }
 0x486   :  { %1215 = vrcp.f32 %v222_v43 }
 0x490   :  { %v1216_v44 = vpop.eup %1215 }
 0x491   :  { %v226_v47 = vmul.f32 %v1216_v44, %v105_v21 }
 0x4f4   :  { %v229_v45 = vpop.permute.xlu1 %228 }
 0x4f5   :  { %v231_v46 = vmul.f32 %v1216_v44, %v229_v45 }
 0x4f7   :  { %233 = vrot.lane.b32.xlu0 %v231_v46, %s1270_s16 }
 0x569   :  { %v234_v48 = vpop.permute.xlu0 %233 }
 0x56a   :  { %v236_v49 = vadd.f32 %v234_v48, %v226_v47 }
 0x56c   :  { %1217 = vtanh.f32 %v236_v49 }
 0x576   :  { %v1218_v50 = vpop.eup %1217 }
 0x577   :  { %239 = vrot.lane.b32.xlu1 %v1218_v50, %s1269_s15 }
 0x5e9   :  { %v240_v51 = vpop.permute.xlu1 %239 }
 0x5ea   :  { %v242_v52 = vmul.f32 %v1216_v44, %v240_v51 }
 0x5ec   :  { %v243_v53 = vpack.c.bf16 %v242_v52, %v242_v52  ;;  %v1027_v52 = vld [vmem:[%s1471_s0 + $0x20] sm:$0xff] }
 0x5ee   :  { %245 = vrot.lane.b32.xlu0 %v243_v53, %s1270_s16 }
 0x660   :  { %v246_v54 = vpop.permute.xlu0 %245 }
 0x661   :  { %1108 = vmatmul.mubr.msk.bf16.vlgmr.msra.gmra.mrb[4].mxu1 %vm21_vm2, %v246_v54 }
 0x662   :  { %1118 = vmatpush3.bf16.msra.mxu1 %v1323_v22  ;;  %1121 = vmatprep.mubr.msk.bf16.mxu1 %vm1268_vm1, %v1267_v0 }
 0x663   :  { %1119 = vmatprep.subr.bf16.mxu1 %v1267_v0 }
 0x666   :  { %1120 = vmatpush3.bf16.msra.mxu1 %v1329_v23 }
 0x667   :  { %1131 = vmatprep.subr.bf16.mxu1 %v1267_v0 }
 0x734   :  { %v284_v55 = vpop.f32.mrb[4].mxu1 }
 0x735   :  { %v292_v56 = vpack.c.bf16 %v284_v55, %v284_v55  ;;  %v1109_v57 = vpop.f32.mrb[5].mxu1 }
 0x736   :  { %v287_v58 = vpop.f32.mrb[6].mxu1 }
 0x737   :  { %v1110_v59 = vpop.f32.mrb[7].mxu1  ;;  %1114 = vmatmul.mubr.msk.bf16.vlgmr.msra.gmra.mrb[8].mxu0 %vm19_vm0, %v292_v56 }
 0x738   :  { %1126 = vmatpush3.bf16.msra.mxu0 %v1296_v1  ;;  %1127 = vmatprep.mubr.msk.bf16.mxu0 %vm1268_vm1, %v1267_v0 }
 0x739   :  { %1139 = vmatprep.subr.bf16.mxu0 %v1267_v0 }
 0x80a   :  { %v330_v61 = vpop.f32.mrb[8].mxu0 }
 0x80b   :  { %v336_v62 = vadd.f32 %v1019_v60, %v330_v61  ;;  %v1115_v63 = vpop.f32.mrb[9].mxu0 }
 0x80c   :  { %v333_v2 = vpop.f32.mrb[10].mxu0 }
 0x80d   :  { %1219 = vtanh.f32 %v336_v62  ;;  %v1116_v3 = vpop.f32.mrb[11].mxu0  ;;  %v1021_v5 = vmul.f32 -1.442695, %v336_v62 }
 0x80f   :  { %1221 = vpow2.f32 %v1021_v5 }
 0x817   :  { %v1220_v4 = vpop.eup %1219 }
 0x818   :  { %346 = vrot.lane.b32.xlu1 %v1220_v4, %s1269_s15 }
 0x819   :  { %v1222_v6 = vpop.eup %1221 }
 0x81a   :  { %v340_v7 = vadd.f32 1.0, %v1222_v6 }
 0x81c   :  { %1223 = vrcp.f32 %v340_v7 }
 0x826   :  { %v1224_v8 = vpop.eup %1223 }
 0x827   :  { %v344_v11 = vmul.f32 %v1224_v8, %v236_v49 }
 0x88a   :  { %v347_v9 = vpop.permute.xlu1 %346 }
 0x88b   :  { %v349_v10 = vmul.f32 %v1224_v8, %v347_v9 }
 0x88d   :  { %351 = vrot.lane.b32.xlu0 %v349_v10, %s1270_s16 }
 0x8ff   :  { %v352_v12 = vpop.permute.xlu0 %351 }
 0x900   :  { %v354_v13 = vadd.f32 %v352_v12, %v344_v11 }
 0x902   :  { %1225 = vtanh.f32 %v354_v13 }
 0x90c   :  { %v1226_v14 = vpop.eup %1225 }
 0x90d   :  { %357 = vrot.lane.b32.xlu1 %v1226_v14, %s1269_s15 }
 0x97f   :  { %v358_v15 = vpop.permute.xlu1 %357 }
 0x980   :  { %v360_v16 = vmul.f32 %v1224_v8, %v358_v15 }
 0x982   :  { %v361_v17 = vpack.c.bf16 %v360_v16, %v360_v16  ;;  %v1031_v16 = vld [vmem:[%s1471_s0 + $0x28] sm:$0xff] }
 0x984   :  { %363 = vrot.lane.b32.xlu0 %v361_v17, %s1270_s16 }
 0x9f6   :  { %v364_v18 = vpop.permute.xlu0 %363 }
 0x9f7   :  { %1122 = vmatmul.mubr.msk.bf16.vlgmr.msra.gmra.mrb[8].mxu1 %vm21_vm2, %v364_v18 }
 0x9f8   :  { %1132 = vmatpush3.bf16.msra.mxu1 %v1323_v22  ;;  %1135 = vmatprep.mubr.msk.bf16.mxu1 %vm1268_vm1, %v1267_v0 }
 0x9f9   :  { %1133 = vmatprep.subr.bf16.mxu1 %v1267_v0 }
 0x9fc   :  { %1134 = vmatpush3.bf16.msra.mxu1 %v1329_v23 }
 0x9fd   :  { %1145 = vmatprep.subr.bf16.mxu1 %v1267_v0 }
 0xaca   :  { %v402_v19 = vpop.f32.mrb[8].mxu1 }
 0xacb   :  { %v410_v20 = vpack.c.bf16 %v402_v19, %v402_v19  ;;  %v1123_v21 = vpop.f32.mrb[9].mxu1 }
 0xacc   :  { %v405_v24 = vpop.f32.mrb[10].mxu1 }
 0xacd   :  { %v1124_v25 = vpop.f32.mrb[11].mxu1  ;;  %1128 = vmatmul.mubr.msk.bf16.vlgmr.msra.gmra.mrb[12].mxu0 %vm19_vm0, %v410_v20 }
 0xace   :  { %1140 = vmatpush3.bf16.msra.mxu0 %v1296_v1  ;;  %1141 = vmatprep.mubr.msk.bf16.mxu0 %vm1268_vm1, %v1267_v0 }
 0xacf   :  { %1153 = vmatprep.subr.bf16.mxu0 %v1267_v0 }
 0xba0   :  { %v448_v27 = vpop.f32.mrb[12].mxu0 }
 0xba1   :  { %v454_v28 = vadd.f32 %v1023_v26, %v448_v27  ;;  %v1129_v29 = vpop.f32.mrb[13].mxu0 }
 0xba2   :  { %v451_v30 = vpop.f32.mrb[14].mxu0 }
 0xba3   :  { %1227 = vtanh.f32 %v454_v28  ;;  %v1130_v31 = vpop.f32.mrb[15].mxu0  ;;  %v1025_v33 = vmul.f32 -1.442695, %v454_v28 }
 0xba5   :  { %1229 = vpow2.f32 %v1025_v33 }
 0xbad   :  { %v1228_v32 = vpop.eup %1227 }
 0xbae   :  { %464 = vrot.lane.b32.xlu1 %v1228_v32, %s1269_s15 }
 0xbaf   :  { %v1230_v34 = vpop.eup %1229 }
 0xbb0   :  { %v458_v35 = vadd.f32 1.0, %v1230_v34 }
 0xbb2   :  { %1231 = vrcp.f32 %v458_v35 }
 0xbbc   :  { %v1232_v36 = vpop.eup %1231 }
 0xbbd   :  { %v462_v39 = vmul.f32 %v1232_v36, %v354_v13 }
 0xc20   :  { %v465_v37 = vpop.permute.xlu1 %464 }
 0xc21   :  { %v467_v38 = vmul.f32 %v1232_v36, %v465_v37 }
 0xc23   :  { %469 = vrot.lane.b32.xlu0 %v467_v38, %s1270_s16 }
 0xc95   :  { %v470_v40 = vpop.permute.xlu0 %469 }
 0xc96   :  { %v472_v41 = vadd.f32 %v470_v40, %v462_v39 }
 0xc98   :  { %1233 = vtanh.f32 %v472_v41 }
 0xca2   :  { %v1234_v42 = vpop.eup %1233 }
 0xca3   :  { %475 = vrot.lane.b32.xlu1 %v1234_v42, %s1269_s15 }
 0xd15   :  { %v476_v43 = vpop.permute.xlu1 %475 }
 0xd16   :  { %v478_v44 = vmul.f32 %v1232_v36, %v476_v43 }
 0xd18   :  { %v479_v45 = vpack.c.bf16 %v478_v44, %v478_v44  ;;  %v1035_v44 = vld [vmem:[%s1471_s0 + $0x30] sm:$0xff] }
 0xd1a   :  { %481 = vrot.lane.b32.xlu0 %v479_v45, %s1270_s16 }
 0xd8c   :  { %v482_v46 = vpop.permute.xlu0 %481 }
 0xd8d   :  { %1136 = vmatmul.mubr.msk.bf16.vlgmr.msra.gmra.mrb[12].mxu1 %vm21_vm2, %v482_v46 }
 0xd8e   :  { %1146 = vmatpush3.bf16.msra.mxu1 %v1323_v22  ;;  %1149 = vmatprep.mubr.msk.bf16.mxu1 %vm1268_vm1, %v1267_v0 }
 0xd8f   :  { %1147 = vmatprep.subr.bf16.mxu1 %v1267_v0 }
 0xd92   :  { %1148 = vmatpush3.bf16.msra.mxu1 %v1329_v23 }
 0xd93   :  { %1159 = vmatprep.subr.bf16.mxu1 %v1267_v0 }
 0xe60   :  { %v520_v47 = vpop.f32.mrb[12].mxu1 }
 0xe61   :  { %v528_v48 = vpack.c.bf16 %v520_v47, %v520_v47  ;;  %v1137_v49 = vpop.f32.mrb[13].mxu1 }
 0xe62   :  { %v523_v50 = vpop.f32.mrb[14].mxu1 }
 0xe63   :  { %v1138_v51 = vpop.f32.mrb[15].mxu1  ;;  %1142 = vmatmul.mubr.msk.bf16.vlgmr.msra.gmra.mrb[16].mxu0 %vm19_vm0, %v528_v48 }
 0xe64   :  { %1154 = vmatpush3.bf16.msra.mxu0 %v1296_v1  ;;  %1155 = vmatprep.mubr.msk.bf16.mxu0 %vm1268_vm1, %v1267_v0 }
 0xe65   :  { %1167 = vmatprep.subr.bf16.mxu0 %v1267_v0 }
 0xf36   :  { %v566_v53 = vpop.f32.mrb[16].mxu0 }
 0xf37   :  { %v572_v54 = vadd.f32 %v1027_v52, %v566_v53  ;;  %v1143_v55 = vpop.f32.mrb[17].mxu0 }
 0xf38   :  { %v569_v56 = vpop.f32.mrb[18].mxu0 }
 0xf39   :  { %1235 = vtanh.f32 %v572_v54  ;;  %v1144_v57 = vpop.f32.mrb[19].mxu0  ;;  %v1029_v59 = vmul.f32 -1.442695, %v572_v54 }
 0xf3b   :  { %1237 = vpow2.f32 %v1029_v59 }
 0xf43   :  { %v1236_v58 = vpop.eup %1235 }
 0xf44   :  { %582 = vrot.lane.b32.xlu1 %v1236_v58, %s1269_s15 }
 0xf45   :  { %v1238_v60 = vpop.eup %1237 }
 0xf46   :  { %v576_v61 = vadd.f32 1.0, %v1238_v60 }
 0xf48   :  { %1239 = vrcp.f32 %v576_v61 }
 0xf52   :  { %v1240_v62 = vpop.eup %1239 }
 0xf53   :  { %v580_v3 = vmul.f32 %v1240_v62, %v472_v41 }
 0xfb6   :  { %v583_v63 = vpop.permute.xlu1 %582 }
 0xfb7   :  { %v585_v2 = vmul.f32 %v1240_v62, %v583_v63 }
 0xfb9   :  { %587 = vrot.lane.b32.xlu0 %v585_v2, %s1270_s16 }
0x102b   :  { %v588_v4 = vpop.permute.xlu0 %587 }
0x102c   :  { %v590_v5 = vadd.f32 %v588_v4, %v580_v3 }
0x102e   :  { %1241 = vtanh.f32 %v590_v5 }
0x1038   :  { %v1242_v6 = vpop.eup %1241 }
0x1039   :  { %593 = vrot.lane.b32.xlu1 %v1242_v6, %s1269_s15 }
0x10ab   :  { %v594_v7 = vpop.permute.xlu1 %593 }
0x10ac   :  { %v596_v8 = vmul.f32 %v1240_v62, %v594_v7  ;;  %v1039_v7 = vld [vmem:[%s1471_s0 + $0x38] sm:$0xff]  ;;  %s1271_s0 = smov 96  }
0x10ae   :  { %v597_v9 = vpack.c.bf16 %v596_v8, %v596_v8 }
0x10b0   :  { %599 = vrot.lane.b32.xlu0 %v597_v9, %s1270_s16 }
0x1122   :  { %v600_v10 = vpop.permute.xlu0 %599 }
0x1123   :  { %1150 = vmatmul.mubr.msk.bf16.vlgmr.msra.gmra.mrb[16].mxu1 %vm21_vm2, %v600_v10 }
0x1124   :  { %1160 = vmatpush3.bf16.msra.mxu1 %v1323_v22  ;;  %1163 = vmatprep.mubr.msk.bf16.mxu1 %vm1268_vm1, %v1267_v0 }
0x1125   :  { %1161 = vmatprep.subr.bf16.mxu1 %v1267_v0 }
0x1128   :  { %1162 = vmatpush3.bf16.msra.mxu1 %v1329_v23 }
0x1129   :  { %1173 = vmatprep.subr.bf16.mxu1 %v1267_v0 }
0x11f6   :  { %v638_v11 = vpop.f32.mrb[16].mxu1 }
0x11f7   :  { %v646_v12 = vpack.c.bf16 %v638_v11, %v638_v11  ;;  %v1151_v13 = vpop.f32.mrb[17].mxu1 }
0x11f8   :  { %v641_v14 = vpop.f32.mrb[18].mxu1 }
0x11f9   :  { %v1152_v15 = vpop.f32.mrb[19].mxu1  ;;  %1156 = vmatmul.mubr.msk.bf16.vlgmr.msra.gmra.mrb[20].mxu0 %vm19_vm0, %v646_v12 }
0x11fa   :  { %1168 = vmatpush3.bf16.msra.mxu0 %v1296_v1  ;;  %1169 = vmatprep.mubr.msk.bf16.mxu0 %vm1268_vm1, %v1267_v0 }
0x11fb   :  { %1181 = vmatprep.subr.bf16.mxu0 %v1267_v0 }
0x12cc   :  { %v684_v17 = vpop.f32.mrb[20].mxu0 }
0x12cd   :  { %v690_v18 = vadd.f32 %v1031_v16, %v684_v17  ;;  %v1157_v19 = vpop.f32.mrb[21].mxu0 }
0x12ce   :  { %v687_v20 = vpop.f32.mrb[22].mxu0 }
0x12cf   :  { %1243 = vtanh.f32 %v690_v18  ;;  %v1158_v21 = vpop.f32.mrb[23].mxu0  ;;  %v1033_v25 = vmul.f32 -1.442695, %v690_v18 }
0x12d1   :  { %1245 = vpow2.f32 %v1033_v25 }
0x12d9   :  { %v1244_v24 = vpop.eup %1243 }
0x12da   :  { %700 = vrot.lane.b32.xlu1 %v1244_v24, %s1269_s15 }
0x12db   :  { %v1246_v26 = vpop.eup %1245 }
0x12dc   :  { %v694_v27 = vadd.f32 1.0, %v1246_v26 }
0x12de   :  { %1247 = vrcp.f32 %v694_v27 }
0x12e8   :  { %v1248_v28 = vpop.eup %1247 }
0x12e9   :  { %v698_v31 = vmul.f32 %v1248_v28, %v590_v5 }
0x134c   :  { %v701_v29 = vpop.permute.xlu1 %700 }
0x134d   :  { %v703_v30 = vmul.f32 %v1248_v28, %v701_v29 }
0x134f   :  { %705 = vrot.lane.b32.xlu0 %v703_v30, %s1270_s16 }
0x13c1   :  { %v706_v32 = vpop.permute.xlu0 %705 }
0x13c2   :  { %v708_v33 = vadd.f32 %v706_v32, %v698_v31 }
0x13c4   :  { %1249 = vtanh.f32 %v708_v33 }
0x13ce   :  { %v1250_v34 = vpop.eup %1249 }
0x13cf   :  { %711 = vrot.lane.b32.xlu1 %v1250_v34, %s1269_s15 }
0x1441   :  { %v712_v35 = vpop.permute.xlu1 %711 }
0x1442   :  { %v714_v36 = vmul.f32 %v1248_v28, %v712_v35 }
0x1444   :  { %v715_v37 = vpack.c.bf16 %v714_v36, %v714_v36 }
0x1446   :  { %717 = vrot.lane.b32.xlu0 %v715_v37, %s1270_s16 }
0x14b8   :  { %v718_v38 = vpop.permute.xlu0 %717 }
0x14b9   :  { %1164 = vmatmul.mubr.msk.bf16.vlgmr.msra.gmra.mrb[20].mxu1 %vm21_vm2, %v718_v38 }
0x14ba   :  { %1174 = vmatpush3.bf16.msra.mxu1 %v1323_v22  ;;  %1177 = vmatprep.mubr.msk.bf16.mxu1 %vm1268_vm1, %v1267_v0 }
0x14bb   :  { %1175 = vmatprep.subr.bf16.mxu1 %v1267_v0 }
0x14be   :  { %1176 = vmatpush3.bf16.msra.mxu1 %v1329_v23 }
0x14bf   :  { %1187 = vmatprep.subr.bf16.mxu1 %v1267_v0 }
0x158c   :  { %v756_v39 = vpop.f32.mrb[20].mxu1 }
0x158d   :  { %v764_v40 = vpack.c.bf16 %v756_v39, %v756_v39  ;;  %v1165_v41 = vpop.f32.mrb[21].mxu1 }
0x158e   :  { %v759_v42 = vpop.f32.mrb[22].mxu1 }
0x158f   :  { %v1166_v43 = vpop.f32.mrb[23].mxu1  ;;  %1170 = vmatmul.mubr.msk.bf16.vlgmr.msra.gmra.mrb[24].mxu0 %vm19_vm0, %v764_v40 }
0x1590   :  { %1182 = vmatpush3.bf16.msra.mxu0 %v1296_v1  ;;  %1183 = vmatprep.mubr.msk.bf16.mxu0 %vm1268_vm1, %v1267_v0 }
0x1662   :  { %v802_v45 = vpop.f32.mrb[24].mxu0 }
0x1663   :  { %v808_v46 = vadd.f32 %v1035_v44, %v802_v45  ;;  %v1171_v47 = vpop.f32.mrb[25].mxu0 }
0x1664   :  { %v805_v48 = vpop.f32.mrb[26].mxu0 }
0x1665   :  { %1251 = vtanh.f32 %v808_v46  ;;  %v1172_v49 = vpop.f32.mrb[27].mxu0  ;;  %v1037_v51 = vmul.f32 -1.442695, %v808_v46 }
0x1667   :  { %1253 = vpow2.f32 %v1037_v51 }
0x166f   :  { %v1252_v50 = vpop.eup %1251 }
0x1670   :  { %818 = vrot.lane.b32.xlu1 %v1252_v50, %s1269_s15 }
0x1671   :  { %v1254_v52 = vpop.eup %1253 }
0x1672   :  { %v812_v1 = vadd.f32 1.0, %v1254_v52 }
0x1674   :  { %1255 = vrcp.f32 %v812_v1 }
0x167e   :  { %v1256_v53 = vpop.eup %1255 }
0x167f   :  { %v816_v56 = vmul.f32 %v1256_v53, %v708_v33 }
0x16e2   :  { %v819_v54 = vpop.permute.xlu1 %818 }
0x16e3   :  { %v821_v55 = vmul.f32 %v1256_v53, %v819_v54 }
0x16e5   :  { %823 = vrot.lane.b32.xlu0 %v821_v55, %s1270_s16 }
0x1757   :  { %v824_v57 = vpop.permute.xlu0 %823 }
0x1758   :  { %v826_v58 = vadd.f32 %v824_v57, %v816_v56 }
0x175a   :  { %1257 = vtanh.f32 %v826_v58 }
0x1764   :  { %v1258_v59 = vpop.eup %1257 }
0x1765   :  { %829 = vrot.lane.b32.xlu1 %v1258_v59, %s1269_s15 }
0x17d7   :  { %v830_v60 = vpop.permute.xlu1 %829 }
0x17d8   :  { %v832_v61 = vmul.f32 %v1256_v53, %v830_v60 }
0x17da   :  { %v833_v62 = vpack.c.bf16 %v832_v61, %v832_v61 }
0x17dc   :  { %835 = vrot.lane.b32.xlu0 %v833_v62, %s1270_s16 }
0x184e   :  { %v836_v63 = vpop.permute.xlu0 %835 }
0x184f   :  { %1178 = vmatmul.mubr.msk.bf16.vlgmr.msra.gmra.mrb[24].mxu1 %vm21_vm2, %v836_v63 }
0x1850   :  { %1188 = vmatpush3.bf16.msra.mxu1 %v1323_v22  ;;  %1191 = vmatprep.mubr.msk.bf16.mxu1 %vm1268_vm1, %v1267_v0 }
0x1851   :  { %1189 = vmatprep.subr.bf16.mxu1 %v1267_v0 }
0x1854   :  { %1190 = vmatpush3.bf16.msra.mxu1 %v1329_v23 }
0x1922   :  { %v874_v2 = vpop.f32.mrb[24].mxu1 }
0x1923   :  { %v882_v3 = vpack.c.bf16 %v874_v2, %v874_v2  ;;  %v1179_v4 = vpop.f32.mrb[25].mxu1 }
0x1924   :  { %v877_v5 = vpop.f32.mrb[26].mxu1 }
0x1925   :  { %v1180_v6 = vpop.f32.mrb[27].mxu1  ;;  %1184 = vmatmul.mubr.msk.bf16.vlgmr.msra.gmra.mrb[28].mxu0 %vm19_vm0, %v882_v3 }
0x19f8   :  { %v920_v8 = vpop.f32.mrb[28].mxu0 }
0x19f9   :  { %v926_v22 = vadd.f32 %v1039_v7, %v920_v8  ;;  %v1185_v9 = vpop.f32.mrb[29].mxu0 }
0x19fa   :  { %v923_v10 = vpop.f32.mrb[30].mxu0 }
0x19fb   :  { %1259 = vtanh.f32 %v926_v22  ;;  %v1186_v11 = vpop.f32.mrb[31].mxu0  ;;  %v1041_v23 = vmul.f32 -1.442695, %v926_v22 }
0x19fd   :  { %1261 = vpow2.f32 %v1041_v23 }
0x1a05   :  { %v1260_v0 = vpop.eup %1259 }
0x1a06   :  { %936 = vrot.lane.b32.xlu1 %v1260_v0, %s1269_s15 }
0x1a07   :  { %v1262_v12 = vpop.eup %1261 }
0x1a08   :  { %v930_v13 = vadd.f32 1.0, %v1262_v12 }
0x1a0a   :  { %1263 = vrcp.f32 %v930_v13 }
0x1a14   :  { %v1264_v14 = vpop.eup %1263 }
0x1a15   :  { %v934_v17 = vmul.f32 %v1264_v14, %v826_v58 }
0x1a78   :  { %v937_v15 = vpop.permute.xlu1 %936 }
0x1a79   :  { %v939_v16 = vmul.f32 %v1264_v14, %v937_v15 }
0x1a7b   :  { %941 = vrot.lane.b32.xlu0 %v939_v16, %s1270_s16 }
0x1aed   :  { %v942_v18 = vpop.permute.xlu0 %941 }
0x1aee   :  { %v944_v19 = vadd.f32 %v942_v18, %v934_v17 }
0x1af0   :  { %1265 = vtanh.f32 %v944_v19 }
0x1afa   :  { %v1266_v20 = vpop.eup %1265 }
0x1afb   :  { %947 = vrot.lane.b32.xlu1 %v1266_v20, %s1269_s15 }
0x1aff   :  { %1000 = vrot.lane.b32.xlu1 %v944_v19, %s1271_s0 }
0x1b6d   :  { %v948_v21 = vpop.permute.xlu1 %947 }
0x1b6e   :  { %v950_v24 = vmul.f32 %v1264_v14, %v948_v21 }
0x1b70   :  { %v951_v25 = vpack.c.bf16 %v950_v24, %v950_v24 }
0x1b71   :  { %v1001_v26 = vpop.permute.xlu1 %1000 }
0x1b72   :  { %1003 = vst.msk [vmem:[#allocation3] sm:$0xff] %vm21_vm2, %v1001_v26  ;;  %953 = vrot.lane.b32.xlu0 %v951_v25, %s1270_s16 }
0x1be4   :  { %v954_v27 = vpop.permute.xlu0 %953 }
0x1be5   :  { %1192 = vmatmul.mubr.msk.bf16.vlgmr.msra.gmra.mrb[28].mxu1 %vm21_vm2, %v954_v27 }
0x1cb8   :  { %v992_v28 = vpop.f32.mrb[28].mxu1 }
0x1cb9   :  { %998 = vst.msk [vmem:[#allocation2] sm:$0xff] %vm19_vm0, %v992_v28  ;;  %1004 = vst.msk [vmem:[%s1473_s3] sm:$0xff] %vm19_vm0, %v992_v28  ;;  %v1193_v29 = vpop.f32.mrb[29].mxu1 }
0x1cba   :  { %v995_v30 = vpop.f32.mrb[30].mxu1 }
0x1cbb   :  { %v1194_v31 = vpop.f32.mrb[31].mxu1 }

</bundles_post_ra>
